<compile_context>
chip_gen: v7x
topology: tpu7x:2x2x1
jax: 0.10.0
libtpu: 0.0.40
codegen_flags: <defaults>
</compile_context>

<pallas_src>
import functools

import jax
import jax.numpy as jnp
from jax import lax
from jax.experimental import pallas as pl
from jax.experimental.pallas import tpu as pltpu

# FastSpeechConfig values used by PositionwiseFeedForward (standard FastSpeech):
FFT_CONV1D_KERNEL = (9, 1)
FFT_CONV1D_PADDING = (4, 0)
EPS = 1e-5            # ScaleNorm eps
MASK_NEG = -1e30      # torch uses -inf (NaN for fully-masked rows); finite is safer
# Set to jnp.bfloat16 on v6e/v7x for ~2x MXU throughput (accumulation stays f32).
MM_DTYPE = jnp.float32


def _scalenorm(x, scale):
    # torch: x * scale / clamp(||x||_2, min=eps) == x * scale * rsqrt(max(sum(x^2), eps^2))
    ssq = jnp.sum(x * x, axis=-1, keepdims=True)
    return x * (scale * lax.rsqrt(jnp.maximum(ssq, EPS * EPS)))


def _mm(a, b):
    return jnp.dot(a.astype(MM_DTYPE), b.astype(MM_DTYPE),
                   preferred_element_type=jnp.float32)


# ---------------------------------------------------------------------------
# Kernel 1: ScaleNorm(x) -> Q/K/V projections -> ScaleNorm on each projection.
# Grid over batch; one (T, C) tile per step.  Constant-index weight blocks are
# DMA'd only once (their block index never changes across the grid).
# ---------------------------------------------------------------------------
def _proj_kernel(x_ref, wq_ref, wk_ref, wv_ref, bq_ref, bk_ref, bv_ref,
                 q_ref, k_ref, v_ref, *, scale):
    xn = _scalenorm(x_ref[0], scale)                     # layer_norm_init(x)
    q = _mm(xn, wq_ref[...]) + bq_ref[...]
    k = _mm(xn, wk_ref[...]) + bk_ref[...]
    v = _mm(xn, wv_ref[...]) + bv_ref[...]
    q_ref[0] = _scalenorm(q, scale)                      # layer_norm_init(q/k/v)
    k_ref[0] = _scalenorm(k, scale)
    v_ref[0] = _scalenorm(v, scale)


# ---------------------------------------------------------------------------
# Kernel 2: scaled dot-product attention per (batch*head):
#   scores = q k^T / temperature, [masked_fill], softmax, attn @ v
# Mask-free variant when slf_attn_mask is None (no zero-mask HBM traffic);
# attn-probability output is optional.
# ---------------------------------------------------------------------------
def _attn_kernel(q_ref, k_ref, v_ref, *rest, inv_temperature, has_mask, need_attn):
    i = 0
    m_ref = None
    if has_mask:
        m_ref = rest[i]; i += 1
    o_ref = rest[i]; i += 1
    a_ref = rest[i] if need_attn else None

    q = q_ref[0].astype(MM_DTYPE)                        # (T, d_k)
    k = k_ref[0].astype(MM_DTYPE)                        # (T, d_k)
    s = lax.dot_general(q, k, (((1,), (1,)), ((), ())),  # q @ k^T
                        preferred_element_type=jnp.float32) * inv_temperature
    if has_mask:
        s = jnp.where(m_ref[0] != 0, MASK_NEG, s)        # masked_fill
    s = s - jnp.max(s, axis=-1, keepdims=True)           # softmax over last dim
    e = jnp.exp(s)
    p = e * pl.reciprocal(jnp.sum(e, axis=-1, keepdims=True), approx=True)
    if need_attn:
        a_ref[0] = p
    o_ref[0] = _mm(p, v_ref[0])                          # (T, d_v); dropout = identity


# ---------------------------------------------------------------------------
# Kernel 3 (fused): MHA residual (+ non_pad_mask) -> ScaleNorm -> in-VMEM zero
# time-padding -> im2col conv1d(k=9) as ONE matmul -> ReLU -> conv1d(k=1)
# -> + FFN residual (+ non_pad_mask).
# ---------------------------------------------------------------------------
def _ffn_kernel(attn_ref, x_ref, *rest, scale, k1, pad1, t, c, has_npm):
    i = 0
    npm_ref = None
    if has_npm:
        npm_ref = rest[i]; i += 1
    w1_ref, b1_ref, w2_ref, b2_ref, o_ref, ypad_ref, slab_ref = rest[i:]

    y = attn_ref[0] + x_ref[0]                           # MHA residual (fused)
    if has_npm:
        y = y * npm_ref[0]
    # in-VMEM zero time-padding of the ScaleNorm'd activations (no jnp.pad pass)
    ypad_ref[pl.ds(0, pad1), :] = jnp.zeros((pad1, c), jnp.float32)
    ypad_ref[pl.ds(pad1 + t, pad1), :] = jnp.zeros((pad1, c), jnp.float32)
    ypad_ref[pl.ds(pad1, t), :] = _scalenorm(y, scale)
    # im2col: conv1d(kernel=k1) becomes ONE matmul with contraction K = k1*C
    for kk in range(k1):
        slab_ref[:, pl.ds(kk * c, c)] = ypad_ref[pl.ds(kk, t), :]
    h = jnp.maximum(_mm(slab_ref[...], w1_ref[...]) + b1_ref[...], 0.0)   # ReLU
    out = _mm(h, w2_ref[...]) + b2_ref[...] + y          # conv2(k=1) + FFN residual
    if has_npm:
        out = out * npm_ref[0]
    o_ref[0] = out


# ---------------------------------------------------------------------------
# Parameters (deterministic synthetic init; shapes follow the nn.Module __init__)
# ---------------------------------------------------------------------------
def init_params(key, d_model, d_inner, n_head, d_k, d_v):
    k1, _ = FFT_CONV1D_KERNEL
    keys = jax.random.split(key, 10)

    def nrm(k, shape, std):
        return (std * jax.random.normal(k, shape)).astype(jnp.float32)

    w1 = nrm(keys[6], (k1, d_model, d_inner), 0.1)       # == conv1.weight[:, :, k].T
    return dict(
        n_head=n_head, d_k=d_k, d_v=d_v,
        # nn.Linear weights stored transposed: (d_model, n_head*d_k) etc.
        wq=nrm(keys[0], (d_model, n_head * d_k), 0.1),
        wk=nrm(keys[1], (d_model, n_head * d_k), 0.1),
        wv=nrm(keys[2], (d_model, n_head * d_v), 0.1),
        bq=nrm(keys[3], (1, n_head * d_k), 0.02),
        bk=nrm(keys[4], (1, n_head * d_k), 0.02),
        bv=nrm(keys[5], (1, n_head * d_v), 0.02),
        scale_attn=float(d_model) ** 0.5,                # ScaleNorm init value
        w1=w1,
        w1_flat=w1.reshape(k1 * d_model, d_inner),       # im2col weight (9*C, d_inner)
        b1=nrm(keys[7], (1, d_inner), 0.02),
        w2=nrm(keys[8], (d_inner, d_model), 0.1),        # conv2.weight[:, :, 0].T
        b2=nrm(keys[9], (1, d_model), 0.02),
        scale_ffn=float(d_model) ** 0.5,
    )


# ---------------------------------------------------------------------------
# Forward pass (Pallas kernels; the only XLA glue left are the two reshapes
# mandated by the module's .view()/.transpose().view() semantics).
# ---------------------------------------------------------------------------
def fft_block_forward(params, enc_input, non_pad_mask=None, slf_attn_mask=None,
                      need_attn=True):
    B, T, C = enc_input.shape
    H, DK, DV = params["n_head"], params["d_k"], params["d_v"]
    assert DK == C // H and DV == C // H, "torch .view() semantics require d_k=d_v=C//H"
    HDK, HDV = H * DK, H * DV
    K1, _ = FFT_CONV1D_KERNEL
    P1, _ = FFT_CONV1D_PADDING
    DH = params["b1"].shape[-1]

    # ---- MultiHeadAttention: ScaleNorm + Q/K/V projections + ScaleNorm ----
    q, k, v = pl.pallas_call(
        functools.partial(_proj_kernel, scale=params["scale_attn"]),
        grid=(B,),
        in_specs=[
            pl.BlockSpec((1, T, C), lambda b: (b, 0, 0)),
            pl.BlockSpec((C, HDK), lambda b: (0, 0)),
            pl.BlockSpec((C, HDK), lambda b: (0, 0)),
            pl.BlockSpec((C, HDV), lambda b: (0, 0)),
            pl.BlockSpec((1, HDK), lambda b: (0, 0)),
            pl.BlockSpec((1, HDK), lambda b: (0, 0)),
            pl.BlockSpec((1, HDV), lambda b: (0, 0)),
        ],
        out_specs=[
            pl.BlockSpec((1, T, HDK), lambda b: (b, 0, 0)),
            pl.BlockSpec((1, T, HDK), lambda b: (b, 0, 0)),
            pl.BlockSpec((1, T, HDV), lambda b: (b, 0, 0)),
        ],
        out_shape=[
            jax.ShapeDtypeStruct((B, T, HDK), jnp.float32),
            jax.ShapeDtypeStruct((B, T, HDK), jnp.float32),
            jax.ShapeDtypeStruct((B, T, HDV), jnp.float32),
        ],
        compiler_params=pltpu.CompilerParams(dimension_semantics=("parallel",)),
    )(enc_input, params["wq"], params["wk"], params["wv"],
      params["bq"], params["bk"], params["bv"])

    # torch: .view(B, H, T, C//H).contiguous().view(-1, T, d_k)  == plain reshape
    qh = q.reshape(B * H, T, DK)
    kh = k.reshape(B * H, T, DK)
    vh = v.reshape(B * H, T, DV)

    # ---- Scaled dot-product attention (per batch*head) ----
    has_mask = slf_attn_mask is not None
    in_specs = [
        pl.BlockSpec((1, T, DK), lambda j: (j, 0, 0)),
        pl.BlockSpec((1, T, DK), lambda j: (j, 0, 0)),
        pl.BlockSpec((1, T, DV), lambda j: (j, 0, 0)),
    ]
    args = [qh, kh, vh]
    if has_mask:
        # torch mask.repeat(H,1,1): head j uses mask[j % B]; read one int8 block
        # straight from the (B, T, T) mask -- no H-times tiling, no f32 mask.
        in_specs.append(pl.BlockSpec((1, T, T), lambda j: (j % B, 0, 0)))
        args.append(slf_attn_mask.astype(jnp.int8))
    out_specs = [pl.BlockSpec((1, T, DV), lambda j: (j, 0, 0))]
    out_shape = [jax.ShapeDtypeStruct((B * H, T, DV), jnp.float32)]
    if need_attn:
        out_specs.append(pl.BlockSpec((1, T, T), lambda j: (j, 0, 0)))
        out_shape.append(jax.ShapeDtypeStruct((B * H, T, T), jnp.float32))

    # TODO(synk): for long sequences, tile the KV axis with an online-softmax
    # (flash) accumulator so the (T, T) block never materializes (v7x 64 MiB VMEM).
    res = pl.pallas_call(
        functools.partial(_attn_kernel, inv_temperature=1.0 / float(DK) ** 0.5,
                          has_mask=has_mask, need_attn=need_attn),
        grid=(B * H,),
        in_specs=in_specs, out_specs=out_specs, out_shape=out_shape,
        compiler_params=pltpu.CompilerParams(dimension_semantics=("parallel",)),
    )(*args)
    if need_attn:
        out_h, attn = res
    else:
        out_h, attn = res[0], None

    # torch: output.transpose(1, 2).contiguous().view(B, T, C)
    # (memory reinterpretation mandated by the module; one fused XLA copy under jit)
    attn_out = jnp.transpose(out_h, (0, 2, 1)).reshape(B, T, C)

    # ---- residual + non_pad_mask + PositionwiseFeedForward (fully fused) ----
    has_npm = non_pad_mask is not None
    ffn_in_specs = [
        pl.BlockSpec((1, T, C), lambda b: (b, 0, 0)),     # attention output
        pl.BlockSpec((1, T, C), lambda b: (b, 0, 0)),     # enc_input (residual)
    ]
    ffn_args = [attn_out, enc_input]
    if has_npm:
        ffn_in_specs.append(pl.BlockSpec((1, T, 1), lambda b: (b, 0, 0)))
        ffn_args.append(non_pad_mask.astype(jnp.float32))
    ffn_in_specs += [
        pl.BlockSpec((K1 * C, DH), lambda b: (0, 0)),     # im2col conv1 weight
        pl.BlockSpec((1, DH), lambda b: (0, 0)),
        pl.BlockSpec((DH, C), lambda b: (0, 0)),
        pl.BlockSpec((1, C), lambda b: (0, 0)),
    ]
    ffn_args += [params["w1_flat"], params["b1"], params["w2"], params["b2"]]

    # TODO(synk): at production sizes on v7x (64 MiB VMEM), tile d_inner
    # (grid over DH with a (K1*C, DH_tile) weight block) instead of loading the
    # whole conv1 weight per step.
    enc_output = pl.pallas_call(
        functools.partial(_ffn_kernel, scale=params["scale_ffn"], k1=K1,
                          pad1=P1, t=T, c=C, has_npm=has_npm),
        grid=(B,),
        in_specs=ffn_in_specs,
        out_specs=pl.BlockSpec((1, T, C), lambda b: (b, 0, 0)),
        out_shape=jax.ShapeDtypeStruct((B, T, C), jnp.float32),
        scratch_shapes=[pltpu.VMEM((T + 2 * P1, C), jnp.float32),
                        pltpu.VMEM((T, K1 * C), jnp.float32)],
        compiler_params=pltpu.CompilerParams(dimension_semantics=("parallel",)),
    )(*ffn_args)

    return enc_output, attn


# ---------------------------------------------------------------------------
# Pure-JAX reference (mirrors the PyTorch forward) for correctness checking.
# ---------------------------------------------------------------------------
def fft_block_reference(params, x, non_pad_mask=None, slf_attn_mask=None):
    hp = lax.Precision.HIGHEST
    B, T, C = x.shape
    H, DK, DV = params["n_head"], params["d_k"], params["d_v"]
    K1, _ = FFT_CONV1D_KERNEL
    P1, _ = FFT_CONV1D_PADDING

    def sn(z, s):
        n = jnp.linalg.norm(z, axis=-1, keepdims=True)
        return z * (s / jnp.maximum(n, EPS))

    xn = sn(x, params["scale_attn"])
    q = jnp.einsum("btc,co->bto", xn, params["wq"], precision=hp) + params["bq"][0]
    k = jnp.einsum("btc,co->bto", xn, params["wk"], precision=hp) + params["bk"][0]
    v = jnp.einsum("btc,co->bto", xn, params["wv"], precision=hp) + params["bv"][0]
    q = sn(q, params["scale_attn"]).reshape(B * H, T, DK)
    k = sn(k, params["scale_attn"]).reshape(B * H, T, DK)
    v = sn(v, params["scale_attn"]).reshape(B * H, T, DV)
    s = jnp.einsum("bqd,bkd->bqk", q, k, precision=hp) / (float(DK) ** 0.5)
    if slf_attn_mask is not None:
        s = jnp.where(jnp.tile(slf_attn_mask, (H, 1, 1)), MASK_NEG, s)
    a = jax.nn.softmax(s, axis=-1)
    o = jnp.einsum("bqk,bkd->bqd", a, v, precision=hp)
    o = jnp.transpose(o, (0, 2, 1)).reshape(B, T, C)
    enc = o + x
    if non_pad_mask is not None:
        enc = enc * non_pad_mask
    yn = sn(enc, params["scale_ffn"])
    ypad = jnp.pad(yn, ((0, 0), (P1, P1), (0, 0)))
    h = params["b1"][0] + sum(
        jnp.einsum("btc,cd->btd", ypad[:, kk:kk + T, :], params["w1"][kk], precision=hp)
        for kk in range(K1))
    h = jnp.maximum(h, 0.0)
    out = jnp.einsum("btd,dc->btc", h, params["w2"], precision=hp) + params["b2"][0]
    out = out + enc
    if non_pad_mask is not None:
        out = out * non_pad_mask
    return out, a


if __name__ == "__main__":
    B, T = 2, 8
    d_model, d_inner, n_head = 32, 64, 2
    d_k = d_v = d_model // n_head

    key = jax.random.PRNGKey(0)
    kx, kp = jax.random.split(key)
    enc_input = jax.random.normal(kx, (B, T, d_model), jnp.float32)
    params = init_params(kp, d_model, d_inner, n_head, d_k, d_v)

    # params are closed over so that Python ints/floats in the dict stay static.
    fwd = jax.jit(functools.partial(fft_block_forward, params))
    out, attn = fwd(enc_input)
    jax.block_until_ready((out, attn))

    ref_out, ref_attn = fft_block_reference(params, enc_input)
    assert out.shape == (B, T, d_model) and attn.shape == (B * n_head, T, T)
    assert jnp.allclose(out, ref_out, atol=1e-2, rtol=1e-2), "enc_output mismatch"
    assert jnp.allclose(attn, ref_attn, atol=1e-2, rtol=1e-2), "attn mismatch"
    print("KERNEL_OK")
</pallas_src>

<mosaic_0001>
module attributes {stable_mosaic.version = 11 : i64} {
  func.func @_attn_kernel(%arg0: i32, %arg1: memref<1x8x16xf32, #tpu.memory_space<vmem>>, %arg2: memref<1x8x16xf32, #tpu.memory_space<vmem>>, %arg3: memref<1x8x16xf32, #tpu.memory_space<vmem>>, %arg4: memref<1x8x16xf32, #tpu.memory_space<vmem>>, %arg5: memref<1x8x8xf32, #tpu.memory_space<vmem>>) attributes {dimension_semantics = [#tpu.dimension_semantics<parallel>], iteration_bounds = array<i64: 4>, scalar_prefetch = 0 : i64, scratch_operands = 0 : i64, tpu.core_type = #tpu.core_type<tc>, window_params = [{transform_indices = @transform_0, window_bounds = array<i64: 1, 8, 16>}, {transform_indices = @transform_1, window_bounds = array<i64: 1, 8, 16>}, {transform_indices = @transform_2, window_bounds = array<i64: 1, 8, 16>}, {transform_indices = @transform_3, window_bounds = array<i64: 1, 8, 16>}, {transform_indices = @transform_4, window_bounds = array<i64: 1, 8, 8>}]} {
    %c0 = arith.constant 0 : index
    %c0_0 = arith.constant 0 : index
    %c0_1 = arith.constant 0 : index
    %0 = vector.load %arg1[%c0, %c0_0, %c0_1] : memref<1x8x16xf32, #tpu.memory_space<vmem>>, vector<1x8x16xf32>
    %1 = vector.shape_cast %0 : vector<1x8x16xf32> to vector<8x16xf32>
    %c0_2 = arith.constant 0 : index
    %c0_3 = arith.constant 0 : index
    %c0_4 = arith.constant 0 : index
    %2 = vector.load %arg2[%c0_2, %c0_3, %c0_4] : memref<1x8x16xf32, #tpu.memory_space<vmem>>, vector<1x8x16xf32>
    %3 = vector.shape_cast %2 : vector<1x8x16xf32> to vector<8x16xf32>
    %cst = arith.constant dense<0.000000e+00> : vector<8x8xf32>
    %4 = tpu.matmul %1, %3, %cst {dimension_numbers = #tpu.dot_dimension_numbers<[1], [1], [0], [0], [0, 0, 1, 0], [], []>} : vector<8x16xf32>, vector<8x16xf32>, vector<8x8xf32> -> vector<8x8xf32>
    %cst_5 = arith.constant 2.500000e-01 : f32
    %5 = vector.broadcast %cst_5 : f32 to vector<8x8xf32>
    %6 = arith.mulf %4, %5 : vector<8x8xf32>
    %cst_6 = arith.constant dense<0xFF800000> : vector<8xf32>
    %7 = vector.multi_reduction <maximumf>, %6, %cst_6 [1] : vector<8x8xf32> to vector<8xf32>
    %8 = vector.shape_cast %7 : vector<8xf32> to vector<8x1xf32>
    %9 = vector.broadcast %8 : vector<8x1xf32> to vector<8x8xf32>
    %10 = arith.subf %6, %9 : vector<8x8xf32>
    %11 = math.exp %10 : vector<8x8xf32>
    %cst_7 = arith.constant dense<0.000000e+00> : vector<8xf32>
    %12 = vector.multi_reduction <add>, %11, %cst_7 [1] : vector<8x8xf32> to vector<8xf32>
    %13 = vector.shape_cast %12 : vector<8xf32> to vector<8x1xf32>
    %14 = tpu.reciprocal %13 {approx = true} : vector<8x1xf32> -> vector<8x1xf32>
    %15 = vector.broadcast %14 : vector<8x1xf32> to vector<8x8xf32>
    %16 = arith.mulf %11, %15 : vector<8x8xf32>
    %c0_8 = arith.constant 0 : index
    %c0_9 = arith.constant 0 : index
    %c0_10 = arith.constant 0 : index
    %17 = vector.load %arg5[%c0_8, %c0_9, %c0_10] : memref<1x8x8xf32, #tpu.memory_space<vmem>>, vector<1x8x8xf32>
    %18 = vector.shape_cast %17 : vector<1x8x8xf32> to vector<8x8xf32>
    %19 = vector.shape_cast %16 : vector<8x8xf32> to vector<1x8x8xf32>
    tpu.vector_store %arg5[%c0_8, %c0_9, %c0_10], %19 {strides = array<i32>} : memref<1x8x8xf32, #tpu.memory_space<vmem>>, vector<1x8x8xf32>,
    %c0_11 = arith.constant 0 : index
    %c0_12 = arith.constant 0 : index
    %c0_13 = arith.constant 0 : index
    %20 = vector.load %arg3[%c0_11, %c0_12, %c0_13] : memref<1x8x16xf32, #tpu.memory_space<vmem>>, vector<1x8x16xf32>
    %21 = vector.shape_cast %20 : vector<1x8x16xf32> to vector<8x16xf32>
    %cst_14 = arith.constant dense<0.000000e+00> : vector<8x16xf32>
    %22 = tpu.matmul %16, %21, %cst_14 {dimension_numbers = #tpu.dot_dimension_numbers<[1], [0], [0], [1], [0, 0, 1, 1], [], []>} : vector<8x8xf32>, vector<8x16xf32>, vector<8x16xf32> -> vector<8x16xf32>
    %c0_15 = arith.constant 0 : index
    %c0_16 = arith.constant 0 : index
    %c0_17 = arith.constant 0 : index
    %23 = vector.load %arg4[%c0_15, %c0_16, %c0_17] : memref<1x8x16xf32, #tpu.memory_space<vmem>>, vector<1x8x16xf32>
    %24 = vector.shape_cast %23 : vector<1x8x16xf32> to vector<8x16xf32>
    %25 = vector.shape_cast %22 : vector<8x16xf32> to vector<1x8x16xf32>
    tpu.vector_store %arg4[%c0_15, %c0_16, %c0_17], %25 {strides = array<i32>} : memref<1x8x16xf32, #tpu.memory_space<vmem>>, vector<1x8x16xf32>,
    return
  }
  func.func @transform_0(%arg0: i32) -> (i32, i32, i32) {
    %c0_i32 = arith.constant 0 : i32
    %c0_i32_0 = arith.constant 0 : i32
    %c0_i32_1 = arith.constant 0 : i32
    return %arg0, %c0_i32, %c0_i32_0 : i32, i32, i32
  }
  func.func @transform_1(%arg0: i32) -> (i32, i32, i32) {
    %c0_i32 = arith.constant 0 : i32
    %c0_i32_0 = arith.constant 0 : i32
    %c0_i32_1 = arith.constant 0 : i32
    return %arg0, %c0_i32, %c0_i32_0 : i32, i32, i32
  }
  func.func @transform_2(%arg0: i32) -> (i32, i32, i32) {
    %c0_i32 = arith.constant 0 : i32
    %c0_i32_0 = arith.constant 0 : i32
    %c0_i32_1 = arith.constant 0 : i32
    return %arg0, %c0_i32, %c0_i32_0 : i32, i32, i32
  }
  func.func @transform_3(%arg0: i32) -> (i32, i32, i32) {
    %c0_i32 = arith.constant 0 : i32
    %c0_i32_0 = arith.constant 0 : i32
    %c0_i32_1 = arith.constant 0 : i32
    return %arg0, %c0_i32, %c0_i32_0 : i32, i32, i32
  }
  func.func @transform_4(%arg0: i32) -> (i32, i32, i32) {
    %c0_i32 = arith.constant 0 : i32
    %c0_i32_0 = arith.constant 0 : i32
    %c0_i32_1 = arith.constant 0 : i32
    return %arg0, %c0_i32, %c0_i32_0 : i32, i32, i32
  }
}

module attributes {stable_mosaic.version = 11 : i64} {
  func.func @_proj_kernel(%arg0: i32, %arg1: memref<1x8x32xf32, #tpu.memory_space<vmem>>, %arg2: memref<32x32xf32, #tpu.memory_space<vmem>>, %arg3: memref<32x32xf32, #tpu.memory_space<vmem>>, %arg4: memref<32x32xf32, #tpu.memory_space<vmem>>, %arg5: memref<1x32xf32, #tpu.memory_space<vmem>>, %arg6: memref<1x32xf32, #tpu.memory_space<vmem>>, %arg7: memref<1x32xf32, #tpu.memory_space<vmem>>, %arg8: memref<1x8x32xf32, #tpu.memory_space<vmem>>, %arg9: memref<1x8x32xf32, #tpu.memory_space<vmem>>, %arg10: memref<1x8x32xf32, #tpu.memory_space<vmem>>) attributes {dimension_semantics = [#tpu.dimension_semantics<parallel>], iteration_bounds = array<i64: 2>, scalar_prefetch = 0 : i64, scratch_operands = 0 : i64, tpu.core_type = #tpu.core_type<tc>, window_params = [{transform_indices = @transform_0, window_bounds = array<i64: 1, 8, 32>}, {pipeline_mode = #tpu.pipeline_mode<synchronous>, transform_indices = @transform_1, window_bounds = array<i64: 32, 32>}, {pipeline_mode = #tpu.pipeline_mode<synchronous>, transform_indices = @transform_2, window_bounds = array<i64: 32, 32>}, {pipeline_mode = #tpu.pipeline_mode<synchronous>, transform_indices = @transform_3, window_bounds = array<i64: 32, 32>}, {pipeline_mode = #tpu.pipeline_mode<synchronous>, transform_indices = @transform_4, window_bounds = array<i64: 1, 32>}, {pipeline_mode = #tpu.pipeline_mode<synchronous>, transform_indices = @transform_5, window_bounds = array<i64: 1, 32>}, {pipeline_mode = #tpu.pipeline_mode<synchronous>, transform_indices = @transform_6, window_bounds = array<i64: 1, 32>}, {transform_indices = @transform_7, window_bounds = array<i64: 1, 8, 32>}, {transform_indices = @transform_8, window_bounds = array<i64: 1, 8, 32>}, {transform_indices = @transform_9, window_bounds = array<i64: 1, 8, 32>}]} {
    %c0 = arith.constant 0 : index
    %c0_0 = arith.constant 0 : index
    %c0_1 = arith.constant 0 : index
    %0 = vector.load %arg1[%c0, %c0_0, %c0_1] : memref<1x8x32xf32, #tpu.memory_space<vmem>>, vector<1x8x32xf32>
    %1 = vector.shape_cast %0 : vector<1x8x32xf32> to vector<8x32xf32>
    %2 = arith.mulf %1, %1 : vector<8x32xf32>
    %cst = arith.constant dense<0.000000e+00> : vector<8xf32>
    %3 = vector.multi_reduction <add>, %2, %cst [1] : vector<8x32xf32> to vector<8xf32>
    %4 = vector.shape_cast %3 : vector<8xf32> to vector<8x1xf32>
    %cst_2 = arith.constant 1.000000e-10 : f32
    %5 = vector.broadcast %cst_2 : f32 to vector<8x1xf32>
    %6 = arith.maximumf %4, %5 : vector<8x1xf32>
    %7 = math.rsqrt %6 : vector<8x1xf32>
    %cst_3 = arith.constant 5.65685415 : f32
    %8 = vector.broadcast %cst_3 : f32 to vector<8x1xf32>
    %9 = arith.mulf %8, %7 : vector<8x1xf32>
    %10 = vector.broadcast %9 : vector<8x1xf32> to vector<8x32xf32>
    %11 = arith.mulf %1, %10 : vector<8x32xf32>
    %c0_4 = arith.constant 0 : index
    %c0_5 = arith.constant 0 : index
    %12 = vector.load %arg2[%c0_4, %c0_5] : memref<32x32xf32, #tpu.memory_space<vmem>>, vector<32x32xf32>
    %cst_6 = arith.constant dense<0.000000e+00> : vector<8x32xf32>
    %13 = tpu.matmul %11, %12, %cst_6 {dimension_numbers = #tpu.dot_dimension_numbers<[1], [0], [0], [1], [0, 0, 1, 1], [], []>} : vector<8x32xf32>, vector<32x32xf32>, vector<8x32xf32> -> vector<8x32xf32>
    %c0_7 = arith.constant 0 : index
    %c0_8 = arith.constant 0 : index
    %14 = vector.load %arg5[%c0_7, %c0_8] : memref<1x32xf32, #tpu.memory_space<vmem>>, vector<1x32xf32>
    %15 = vector.broadcast %14 : vector<1x32xf32> to vector<8x32xf32>
    %16 = arith.addf %13, %15 : vector<8x32xf32>
    %c0_9 = arith.constant 0 : index
    %c0_10 = arith.constant 0 : index
    %17 = vector.load %arg3[%c0_9, %c0_10] : memref<32x32xf32, #tpu.memory_space<vmem>>, vector<32x32xf32>
    %cst_11 = arith.constant dense<0.000000e+00> : vector<8x32xf32>
    %18 = tpu.matmul %11, %17, %cst_11 {dimension_numbers = #tpu.dot_dimension_numbers<[1], [0], [0], [1], [0, 0, 1, 1], [], []>} : vector<8x32xf32>, vector<32x32xf32>, vector<8x32xf32> -> vector<8x32xf32>
    %c0_12 = arith.constant 0 : index
    %c0_13 = arith.constant 0 : index
    %19 = vector.load %arg6[%c0_12, %c0_13] : memref<1x32xf32, #tpu.memory_space<vmem>>, vector<1x32xf32>
    %20 = vector.broadcast %19 : vector<1x32xf32> to vector<8x32xf32>
    %21 = arith.addf %18, %20 : vector<8x32xf32>
    %c0_14 = arith.constant 0 : index
    %c0_15 = arith.constant 0 : index
    %22 = vector.load %arg4[%c0_14, %c0_15] : memref<32x32xf32, #tpu.memory_space<vmem>>, vector<32x32xf32>
    %cst_16 = arith.constant dense<0.000000e+00> : vector<8x32xf32>
    %23 = tpu.matmul %11, %22, %cst_16 {dimension_numbers = #tpu.dot_dimension_numbers<[1], [0], [0], [1], [0, 0, 1, 1], [], []>} : vector<8x32xf32>, vector<32x32xf32>, vector<8x32xf32> -> vector<8x32xf32>
    %c0_17 = arith.constant 0 : index
    %c0_18 = arith.constant 0 : index
    %24 = vector.load %arg7[%c0_17, %c0_18] : memref<1x32xf32, #tpu.memory_space<vmem>>, vector<1x32xf32>
    %25 = vector.broadcast %24 : vector<1x32xf32> to vector<8x32xf32>
    %26 = arith.addf %23, %25 : vector<8x32xf32>
    %27 = arith.mulf %16, %16 : vector<8x32xf32>
    %cst_19 = arith.constant dense<0.000000e+00> : vector<8xf32>
    %28 = vector.multi_reduction <add>, %27, %cst_19 [1] : vector<8x32xf32> to vector<8xf32>
    %29 = vector.shape_cast %28 : vector<8xf32> to vector<8x1xf32>
    %cst_20 = arith.constant 1.000000e-10 : f32
    %30 = vector.broadcast %cst_20 : f32 to vector<8x1xf32>
    %31 = arith.maximumf %29, %30 : vector<8x1xf32>
    %32 = math.rsqrt %31 : vector<8x1xf32>
    %cst_21 = arith.constant 5.65685415 : f32
    %33 = vector.broadcast %cst_21 : f32 to vector<8x1xf32>
    %34 = arith.mulf %33, %32 : vector<8x1xf32>
    %35 = vector.broadcast %34 : vector<8x1xf32> to vector<8x32xf32>
    %36 = arith.mulf %16, %35 : vector<8x32xf32>
    %c0_22 = arith.constant 0 : index
    %c0_23 = arith.constant 0 : index
    %c0_24 = arith.constant 0 : index
    %37 = vector.load %arg8[%c0_22, %c0_23, %c0_24] : memref<1x8x32xf32, #tpu.memory_space<vmem>>, vector<1x8x32xf32>
    %38 = vector.shape_cast %37 : vector<1x8x32xf32> to vector<8x32xf32>
    %39 = vector.shape_cast %36 : vector<8x32xf32> to vector<1x8x32xf32>
    tpu.vector_store %arg8[%c0_22, %c0_23, %c0_24], %39 {strides = array<i32>} : memref<1x8x32xf32, #tpu.memory_space<vmem>>, vector<1x8x32xf32>,
    %40 = arith.mulf %21, %21 : vector<8x32xf32>
    %cst_25 = arith.constant dense<0.000000e+00> : vector<8xf32>
    %41 = vector.multi_reduction <add>, %40, %cst_25 [1] : vector<8x32xf32> to vector<8xf32>
    %42 = vector.shape_cast %41 : vector<8xf32> to vector<8x1xf32>
    %cst_26 = arith.constant 1.000000e-10 : f32
    %43 = vector.broadcast %cst_26 : f32 to vector<8x1xf32>
    %44 = arith.maximumf %42, %43 : vector<8x1xf32>
    %45 = math.rsqrt %44 : vector<8x1xf32>
    %cst_27 = arith.constant 5.65685415 : f32
    %46 = vector.broadcast %cst_27 : f32 to vector<8x1xf32>
    %47 = arith.mulf %46, %45 : vector<8x1xf32>
    %48 = vector.broadcast %47 : vector<8x1xf32> to vector<8x32xf32>
    %49 = arith.mulf %21, %48 : vector<8x32xf32>
    %c0_28 = arith.constant 0 : index
    %c0_29 = arith.constant 0 : index
    %c0_30 = arith.constant 0 : index
    %50 = vector.load %arg9[%c0_28, %c0_29, %c0_30] : memref<1x8x32xf32, #tpu.memory_space<vmem>>, vector<1x8x32xf32>
    %51 = vector.shape_cast %50 : vector<1x8x32xf32> to vector<8x32xf32>
    %52 = vector.shape_cast %49 : vector<8x32xf32> to vector<1x8x32xf32>
    tpu.vector_store %arg9[%c0_28, %c0_29, %c0_30], %52 {strides = array<i32>} : memref<1x8x32xf32, #tpu.memory_space<vmem>>, vector<1x8x32xf32>,
    %53 = arith.mulf %26, %26 : vector<8x32xf32>
    %cst_31 = arith.constant dense<0.000000e+00> : vector<8xf32>
    %54 = vector.multi_reduction <add>, %53, %cst_31 [1] : vector<8x32xf32> to vector<8xf32>
    %55 = vector.shape_cast %54 : vector<8xf32> to vector<8x1xf32>
    %cst_32 = arith.constant 1.000000e-10 : f32
    %56 = vector.broadcast %cst_32 : f32 to vector<8x1xf32>
    %57 = arith.maximumf %55, %56 : vector<8x1xf32>
    %58 = math.rsqrt %57 : vector<8x1xf32>
    %cst_33 = arith.constant 5.65685415 : f32
    %59 = vector.broadcast %cst_33 : f32 to vector<8x1xf32>
    %60 = arith.mulf %59, %58 : vector<8x1xf32>
    %61 = vector.broadcast %60 : vector<8x1xf32> to vector<8x32xf32>
    %62 = arith.mulf %26, %61 : vector<8x32xf32>
    %c0_34 = arith.constant 0 : index
    %c0_35 = arith.constant 0 : index
    %c0_36 = arith.constant 0 : index
    %63 = vector.load %arg10[%c0_34, %c0_35, %c0_36] : memref<1x8x32xf32, #tpu.memory_space<vmem>>, vector<1x8x32xf32>
    %64 = vector.shape_cast %63 : vector<1x8x32xf32> to vector<8x32xf32>
    %65 = vector.shape_cast %62 : vector<8x32xf32> to vector<1x8x32xf32>
    tpu.vector_store %arg10[%c0_34, %c0_35, %c0_36], %65 {strides = array<i32>} : memref<1x8x32xf32, #tpu.memory_space<vmem>>, vector<1x8x32xf32>,
    return
  }
  func.func @transform_0(%arg0: i32) -> (i32, i32, i32) {
    %c0_i32 = arith.constant 0 : i32
    %c0_i32_0 = arith.constant 0 : i32
    %c0_i32_1 = arith.constant 0 : i32
    return %arg0, %c0_i32, %c0_i32_0 : i32, i32, i32
  }
  func.func @transform_1(%arg0: i32) -> (i32, i32) {
    %c0_i32 = arith.constant 0 : i32
    %c0_i32_0 = arith.constant 0 : i32
    %c0_i32_1 = arith.constant 0 : i32
    return %c0_i32, %c0_i32_0 : i32, i32
  }
  func.func @transform_2(%arg0: i32) -> (i32, i32) {
    %c0_i32 = arith.constant 0 : i32
    %c0_i32_0 = arith.constant 0 : i32
    %c0_i32_1 = arith.constant 0 : i32
    return %c0_i32, %c0_i32_0 : i32, i32
  }
  func.func @transform_3(%arg0: i32) -> (i32, i32) {
    %c0_i32 = arith.constant 0 : i32
    %c0_i32_0 = arith.constant 0 : i32
    %c0_i32_1 = arith.constant 0 : i32
    return %c0_i32, %c0_i32_0 : i32, i32
  }
  func.func @transform_4(%arg0: i32) -> (i32, i32) {
    %c0_i32 = arith.constant 0 : i32
    %c0_i32_0 = arith.constant 0 : i32
    %c0_i32_1 = arith.constant 0 : i32
    return %c0_i32, %c0_i32_0 : i32, i32
  }
  func.func @transform_5(%arg0: i32) -> (i32, i32) {
    %c0_i32 = arith.constant 0 : i32
    %c0_i32_0 = arith.constant 0 : i32
    %c0_i32_1 = arith.constant 0 : i32
    return %c0_i32, %c0_i32_0 : i32, i32
  }
  func.func @transform_6(%arg0: i32) -> (i32, i32) {
    %c0_i32 = arith.constant 0 : i32
    %c0_i32_0 = arith.constant 0 : i32
    %c0_i32_1 = arith.constant 0 : i32
    return %c0_i32, %c0_i32_0 : i32, i32
  }
  func.func @transform_7(%arg0: i32) -> (i32, i32, i32) {
    %c0_i32 = arith.constant 0 : i32
    %c0_i32_0 = arith.constant 0 : i32
    %c0_i32_1 = arith.constant 0 : i32
    return %arg0, %c0_i32, %c0_i32_0 : i32, i32, i32
  }
  func.func @transform_8(%arg0: i32) -> (i32, i32, i32) {
    %c0_i32 = arith.constant 0 : i32
    %c0_i32_0 = arith.constant 0 : i32
    %c0_i32_1 = arith.constant 0 : i32
    return %arg0, %c0_i32, %c0_i32_0 : i32, i32, i32
  }
  func.func @transform_9(%arg0: i32) -> (i32, i32, i32) {
    %c0_i32 = arith.constant 0 : i32
    %c0_i32_0 = arith.constant 0 : i32
    %c0_i32_1 = arith.constant 0 : i32
    return %arg0, %c0_i32, %c0_i32_0 : i32, i32, i32
  }
}

module attributes {stable_mosaic.version = 11 : i64} {
  func.func @_ffn_kernel(%arg0: i32, %arg1: memref<1x8x32xf32, #tpu.memory_space<vmem>>, %arg2: memref<1x8x32xf32, #tpu.memory_space<vmem>>, %arg3: memref<288x64xf32, #tpu.memory_space<vmem>>, %arg4: memref<1x64xf32, #tpu.memory_space<vmem>>, %arg5: memref<64x32xf32, #tpu.memory_space<vmem>>, %arg6: memref<1x32xf32, #tpu.memory_space<vmem>>, %arg7: memref<1x8x32xf32, #tpu.memory_space<vmem>>, %arg8: memref<16x32xf32, #tpu.memory_space<vmem>>, %arg9: memref<8x288xf32, #tpu.memory_space<vmem>>) attributes {dimension_semantics = [#tpu.dimension_semantics<parallel>], iteration_bounds = array<i64: 2>, scalar_prefetch = 0 : i64, scratch_operands = 2 : i64, tpu.core_type = #tpu.core_type<tc>, window_params = [{transform_indices = @transform_0, window_bounds = array<i64: 1, 8, 32>}, {transform_indices = @transform_1, window_bounds = array<i64: 1, 8, 32>}, {pipeline_mode = #tpu.pipeline_mode<synchronous>, transform_indices = @transform_2, window_bounds = array<i64: 288, 64>}, {pipeline_mode = #tpu.pipeline_mode<synchronous>, transform_indices = @transform_3, window_bounds = array<i64: 1, 64>}, {pipeline_mode = #tpu.pipeline_mode<synchronous>, transform_indices = @transform_4, window_bounds = array<i64: 64, 32>}, {pipeline_mode = #tpu.pipeline_mode<synchronous>, transform_indices = @transform_5, window_bounds = array<i64: 1, 32>}, {transform_indices = @transform_6, window_bounds = array<i64: 1, 8, 32>}]} {
    %c0 = arith.constant 0 : index
    %c0_0 = arith.constant 0 : index
    %c0_1 = arith.constant 0 : index
    %0 = vector.load %arg1[%c0, %c0_0, %c0_1] : memref<1x8x32xf32, #tpu.memory_space<vmem>>, vector<1x8x32xf32>
    %1 = vector.shape_cast %0 : vector<1x8x32xf32> to vector<8x32xf32>
    %c0_2 = arith.constant 0 : index
    %c0_3 = arith.constant 0 : index
    %c0_4 = arith.constant 0 : index
    %2 = vector.load %arg2[%c0_2, %c0_3, %c0_4] : memref<1x8x32xf32, #tpu.memory_space<vmem>>, vector<1x8x32xf32>
    %3 = vector.shape_cast %2 : vector<1x8x32xf32> to vector<8x32xf32>
    %4 = arith.addf %1, %3 : vector<8x32xf32>
    %cst = arith.constant 0.000000e+00 : f32
    %5 = vector.broadcast %cst : f32 to vector<4x32xf32>
    %c0_5 = arith.constant 0 : index
    %c0_6 = arith.constant 0 : index
    %6 = vector.load %arg8[%c0_5, %c0_6] : memref<16x32xf32, #tpu.memory_space<vmem>>, vector<4x32xf32>
    tpu.vector_store %arg8[%c0_5, %c0_6], %5 {strides = array<i32>} : memref<16x32xf32, #tpu.memory_space<vmem>>, vector<4x32xf32>,
    %cst_7 = arith.constant 0.000000e+00 : f32
    %7 = vector.broadcast %cst_7 : f32 to vector<4x32xf32>
    %c12 = arith.constant 12 : index
    %c0_8 = arith.constant 0 : index
    %8 = vector.load %arg8[%c12, %c0_8] : memref<16x32xf32, #tpu.memory_space<vmem>>, vector<4x32xf32>
    tpu.vector_store %arg8[%c12, %c0_8], %7 {strides = array<i32>} : memref<16x32xf32, #tpu.memory_space<vmem>>, vector<4x32xf32>,
    %9 = arith.mulf %4, %4 : vector<8x32xf32>
    %cst_9 = arith.constant dense<0.000000e+00> : vector<8xf32>
    %10 = vector.multi_reduction <add>, %9, %cst_9 [1] : vector<8x32xf32> to vector<8xf32>
    %11 = vector.shape_cast %10 : vector<8xf32> to vector<8x1xf32>
    %cst_10 = arith.constant 1.000000e-10 : f32
    %12 = vector.broadcast %cst_10 : f32 to vector<8x1xf32>
    %13 = arith.maximumf %11, %12 : vector<8x1xf32>
    %14 = math.rsqrt %13 : vector<8x1xf32>
    %cst_11 = arith.constant 5.65685415 : f32
    %15 = vector.broadcast %cst_11 : f32 to vector<8x1xf32>
    %16 = arith.mulf %15, %14 : vector<8x1xf32>
    %17 = vector.broadcast %16 : vector<8x1xf32> to vector<8x32xf32>
    %18 = arith.mulf %4, %17 : vector<8x32xf32>
    %c4 = arith.constant 4 : index
    %c0_12 = arith.constant 0 : index
    %19 = vector.load %arg8[%c4, %c0_12] : memref<16x32xf32, #tpu.memory_space<vmem>>, vector<8x32xf32>
    tpu.vector_store %arg8[%c4, %c0_12], %18 {strides = array<i32>} : memref<16x32xf32, #tpu.memory_space<vmem>>, vector<8x32xf32>,
    %c0_13 = arith.constant 0 : index
    %c0_14 = arith.constant 0 : index
    %20 = vector.load %arg8[%c0_13, %c0_14] : memref<16x32xf32, #tpu.memory_space<vmem>>, vector<8x32xf32>
    %c0_15 = arith.constant 0 : index
    %c0_16 = arith.constant 0 : index
    %21 = vector.load %arg9[%c0_15, %c0_16] : memref<8x288xf32, #tpu.memory_space<vmem>>, vector<8x32xf32>
    tpu.vector_store %arg9[%c0_15, %c0_16], %20 {strides = array<i32>} : memref<8x288xf32, #tpu.memory_space<vmem>>, vector<8x32xf32>,
    %c1 = arith.constant 1 : index
    %c0_17 = arith.constant 0 : index
    %22 = vector.load %arg8[%c1, %c0_17] : memref<16x32xf32, #tpu.memory_space<vmem>>, vector<8x32xf32>
    %c0_18 = arith.constant 0 : index
    %c32 = arith.constant 32 : index
    %23 = vector.load %arg9[%c0_18, %c32] : memref<8x288xf32, #tpu.memory_space<vmem>>, vector<8x32xf32>
    tpu.vector_store %arg9[%c0_18, %c32], %22 {strides = array<i32>} : memref<8x288xf32, #tpu.memory_space<vmem>>, vector<8x32xf32>,
    %c2 = arith.constant 2 : index
    %c0_19 = arith.constant 0 : index
    %24 = vector.load %arg8[%c2, %c0_19] : memref<16x32xf32, #tpu.memory_space<vmem>>, vector<8x32xf32>
    %c0_20 = arith.constant 0 : index
    %c64 = arith.constant 64 : index
    %25 = vector.load %arg9[%c0_20, %c64] : memref<8x288xf32, #tpu.memory_space<vmem>>, vector<8x32xf32>
    tpu.vector_store %arg9[%c0_20, %c64], %24 {strides = array<i32>} : memref<8x288xf32, #tpu.memory_space<vmem>>, vector<8x32xf32>,
    %c3 = arith.constant 3 : index
    %c0_21 = arith.constant 0 : index
    %26 = vector.load %arg8[%c3, %c0_21] : memref<16x32xf32, #tpu.memory_space<vmem>>, vector<8x32xf32>
    %c0_22 = arith.constant 0 : index
    %c96 = arith.constant 96 : index
    %27 = vector.load %arg9[%c0_22, %c96] : memref<8x288xf32, #tpu.memory_space<vmem>>, vector<8x32xf32>
    tpu.vector_store %arg9[%c0_22, %c96], %26 {strides = array<i32>} : memref<8x288xf32, #tpu.memory_space<vmem>>, vector<8x32xf32>,
    %c4_23 = arith.constant 4 : index
    %c0_24 = arith.constant 0 : index
    %28 = vector.load %arg8[%c4_23, %c0_24] : memref<16x32xf32, #tpu.memory_space<vmem>>, vector<8x32xf32>
    %c0_25 = arith.constant 0 : index
    %c128 = arith.constant 128 : index
    %29 = vector.load %arg9[%c0_25, %c128] : memref<8x288xf32, #tpu.memory_space<vmem>>, vector<8x32xf32>
    tpu.vector_store %arg9[%c0_25, %c128], %28 {strides = array<i32>} : memref<8x288xf32, #tpu.memory_space<vmem>>, vector<8x32xf32>,
    %c5 = arith.constant 5 : index
    %c0_26 = arith.constant 0 : index
    %30 = vector.load %arg8[%c5, %c0_26] : memref<16x32xf32, #tpu.memory_space<vmem>>, vector<8x32xf32>
    %c0_27 = arith.constant 0 : index
    %c160 = arith.constant 160 : index
    %31 = vector.load %arg9[%c0_27, %c160] : memref<8x288xf32, #tpu.memory_space<vmem>>, vector<8x32xf32>
    tpu.vector_store %arg9[%c0_27, %c160], %30 {strides = array<i32>} : memref<8x288xf32, #tpu.memory_space<vmem>>, vector<8x32xf32>,
    %c6 = arith.constant 6 : index
    %c0_28 = arith.constant 0 : index
    %32 = vector.load %arg8[%c6, %c0_28] : memref<16x32xf32, #tpu.memory_space<vmem>>, vector<8x32xf32>
    %c0_29 = arith.constant 0 : index
    %c192 = arith.constant 192 : index
    %33 = vector.load %arg9[%c0_29, %c192] : memref<8x288xf32, #tpu.memory_space<vmem>>, vector<8x32xf32>
    tpu.vector_store %arg9[%c0_29, %c192], %32 {strides = array<i32>} : memref<8x288xf32, #tpu.memory_space<vmem>>, vector<8x32xf32>,
    %c7 = arith.constant 7 : index
    %c0_30 = arith.constant 0 : index
    %34 = vector.load %arg8[%c7, %c0_30] : memref<16x32xf32, #tpu.memory_space<vmem>>, vector<8x32xf32>
    %c0_31 = arith.constant 0 : index
    %c224 = arith.constant 224 : index
    %35 = vector.load %arg9[%c0_31, %c224] : memref<8x288xf32, #tpu.memory_space<vmem>>, vector<8x32xf32>
    tpu.vector_store %arg9[%c0_31, %c224], %34 {strides = array<i32>} : memref<8x288xf32, #tpu.memory_space<vmem>>, vector<8x32xf32>,
    %c8 = arith.constant 8 : index
    %c0_32 = arith.constant 0 : index
    %36 = vector.load %arg8[%c8, %c0_32] : memref<16x32xf32, #tpu.memory_space<vmem>>, vector<8x32xf32>
    %c0_33 = arith.constant 0 : index
    %c256 = arith.constant 256 : index
    %37 = vector.load %arg9[%c0_33, %c256] : memref<8x288xf32, #tpu.memory_space<vmem>>, vector<8x32xf32>
    tpu.vector_store %arg9[%c0_33, %c256], %36 {strides = array<i32>} : memref<8x288xf32, #tpu.memory_space<vmem>>, vector<8x32xf32>,
    %c0_34 = arith.constant 0 : index
    %c0_35 = arith.constant 0 : index
    %38 = vector.load %arg9[%c0_34, %c0_35] : memref<8x288xf32, #tpu.memory_space<vmem>>, vector<8x288xf32>
    %c0_36 = arith.constant 0 : index
    %c0_37 = arith.constant 0 : index
    %39 = vector.load %arg3[%c0_36, %c0_37] : memref<288x64xf32, #tpu.memory_space<vmem>>, vector<288x64xf32>
    %cst_38 = arith.constant dense<0.000000e+00> : vector<8x64xf32>
    %40 = tpu.matmul %38, %39, %cst_38 {dimension_numbers = #tpu.dot_dimension_numbers<[1], [0], [0], [1], [0, 0, 1, 1], [], []>} : vector<8x288xf32>, vector<288x64xf32>, vector<8x64xf32> -> vector<8x64xf32>
    %c0_39 = arith.constant 0 : index
    %c0_40 = arith.constant 0 : index
    %41 = vector.load %arg4[%c0_39, %c0_40] : memref<1x64xf32, #tpu.memory_space<vmem>>, vector<1x64xf32>
    %42 = vector.broadcast %41 : vector<1x64xf32> to vector<8x64xf32>
    %43 = arith.addf %40, %42 : vector<8x64xf32>
    %cst_41 = arith.constant 0.000000e+00 : f32
    %44 = vector.broadcast %cst_41 : f32 to vector<8x64xf32>
    %45 = arith.maximumf %43, %44 : vector<8x64xf32>
    %c0_42 = arith.constant 0 : index
    %c0_43 = arith.constant 0 : index
    %46 = vector.load %arg5[%c0_42, %c0_43] : memref<64x32xf32, #tpu.memory_space<vmem>>, vector<64x32xf32>
    %cst_44 = arith.constant dense<0.000000e+00> : vector<8x32xf32>
    %47 = tpu.matmul %45, %46, %cst_44 {dimension_numbers = #tpu.dot_dimension_numbers<[1], [0], [0], [1], [0, 0, 1, 1], [], []>} : vector<8x64xf32>, vector<64x32xf32>, vector<8x32xf32> -> vector<8x32xf32>
    %c0_45 = arith.constant 0 : index
    %c0_46 = arith.constant 0 : index
    %48 = vector.load %arg6[%c0_45, %c0_46] : memref<1x32xf32, #tpu.memory_space<vmem>>, vector<1x32xf32>
    %49 = vector.broadcast %48 : vector<1x32xf32> to vector<8x32xf32>
    %50 = arith.addf %47, %49 : vector<8x32xf32>
    %51 = arith.addf %50, %4 : vector<8x32xf32>
    %c0_47 = arith.constant 0 : index
    %c0_48 = arith.constant 0 : index
    %c0_49 = arith.constant 0 : index
    %52 = vector.load %arg7[%c0_47, %c0_48, %c0_49] : memref<1x8x32xf32, #tpu.memory_space<vmem>>, vector<1x8x32xf32>
    %53 = vector.shape_cast %52 : vector<1x8x32xf32> to vector<8x32xf32>
    %54 = vector.shape_cast %51 : vector<8x32xf32> to vector<1x8x32xf32>
    tpu.vector_store %arg7[%c0_47, %c0_48, %c0_49], %54 {strides = array<i32>} : memref<1x8x32xf32, #tpu.memory_space<vmem>>, vector<1x8x32xf32>,
    return
  }
  func.func @transform_0(%arg0: i32) -> (i32, i32, i32) {
    %c0_i32 = arith.constant 0 : i32
    %c0_i32_0 = arith.constant 0 : i32
    %c0_i32_1 = arith.constant 0 : i32
    return %arg0, %c0_i32, %c0_i32_0 : i32, i32, i32
  }
  func.func @transform_1(%arg0: i32) -> (i32, i32, i32) {
    %c0_i32 = arith.constant 0 : i32
    %c0_i32_0 = arith.constant 0 : i32
    %c0_i32_1 = arith.constant 0 : i32
    return %arg0, %c0_i32, %c0_i32_0 : i32, i32, i32
  }
  func.func @transform_2(%arg0: i32) -> (i32, i32) {
    %c0_i32 = arith.constant 0 : i32
    %c0_i32_0 = arith.constant 0 : i32
    %c0_i32_1 = arith.constant 0 : i32
    return %c0_i32, %c0_i32_0 : i32, i32
  }
  func.func @transform_3(%arg0: i32) -> (i32, i32) {
    %c0_i32 = arith.constant 0 : i32
    %c0_i32_0 = arith.constant 0 : i32
    %c0_i32_1 = arith.constant 0 : i32
    return %c0_i32, %c0_i32_0 : i32, i32
  }
  func.func @transform_4(%arg0: i32) -> (i32, i32) {
    %c0_i32 = arith.constant 0 : i32
    %c0_i32_0 = arith.constant 0 : i32
    %c0_i32_1 = arith.constant 0 : i32
    return %c0_i32, %c0_i32_0 : i32, i32
  }
  func.func @transform_5(%arg0: i32) -> (i32, i32) {
    %c0_i32 = arith.constant 0 : i32
    %c0_i32_0 = arith.constant 0 : i32
    %c0_i32_1 = arith.constant 0 : i32
    return %c0_i32, %c0_i32_0 : i32, i32
  }
  func.func @transform_6(%arg0: i32) -> (i32, i32, i32) {
    %c0_i32 = arith.constant 0 : i32
    %c0_i32_0 = arith.constant 0 : i32
    %c0_i32_1 = arith.constant 0 : i32
    return %arg0, %c0_i32, %c0_i32_0 : i32, i32, i32
  }
}

</mosaic_0001>

<bundles_post_ra>
// kernel: fft_block_forward.4
= control target key start
LH: loop header
LB: loop body
LE: loop exit
PB: predicated region body
PF: predicated region fallthrough
CT: control target
= control target key end

     0   :  { %10 = vsyncpa [#allocation3], 0  ;;  %s817_s0 = inlined_call_operand.vmem [shape: f32[4,8,16], index: 0, kind: input, shape index: {}]   ;;  %s818_s1 = inlined_call_operand.vmem [shape: f32[4,8,16], index: 1, kind: input, shape index: {}]   ;;  %s819_s2 = inlined_call_operand.vmem [shape: f32[4,8,16], index: 2, kind: input, shape index: {}]   ;;  %s820_s3 = inlined_call_operand.vmem [shape: f32[4,8,16], index: 3, kind: output, shape index: {0}]   ;;  %s821_s4 = inlined_call_operand.hbm [shape: f32[4,8,8], index: 4, kind: output, shape index: {1}]  }
   0x1   :  { %12 = vsyncpa [#allocation3 + $0x1], 0  ;;  %s701_s15 = smov 0   ;;  %s703_s16 = smov 0  }
   0x2   :  { %s705_s17 = smov 0   ;;  %s707_s18 = smov 0  }
   0x3 LB: > { %s722_s19 = sadd.s32 4294967295, %s671_s18   ;;  %s534_s20 = sadd.s32 4294967294, %s671_s18   ;;  %s671_s18 = sphi %s707_s18, %s827_s18   ;;  %s667_s17 = sphi %s705_s17, %s826_s17   ;;  %s663_s16 = sphi %s703_s16, %s825_s16   ;;  %s659_s15 = sphi %s701_s15, %s824_s15  }
   0x4   : > { %s726_s21 = sadd.s32 1, %s671_s18   ;;  %s129_s22 = sadd.s32 1, %s667_s17 }
   0x5   : > { %s126_s23 = ssub.s32 %s671_s18, %s726_s21  ;;  %p139_p0 = scmp.ne.s32.totalorder %s667_s17, %s663_s16 }
   0x6   : > { %p127_p1 = scmp.eq.s32.totalorder %s126_s23, 0  ;;  %p140_p2 = scmp.eq.s32.totalorder %s722_s19, 3 }
   0x7   : > { %p145_p3 = scmp.ne.s32.totalorder %s663_s16, %s659_s15  ;;  %p146_p4 = scmp.eq.s32.totalorder %s534_s20, 3 }
   0x8   : > { %s737_s24 = scalar_select %p127_p1, %s667_s17, %s129_s22  }
   0x9   : > { %p739_p5 = por %p140_p2, %p139_p0  ;;  %p743_p6 = por %p146_p4, %p145_p3 }
   0xa   : > { %p537_p7 = scmp.ge.s32.totalorder %s671_s18, 1  ;;  %p185_p8 = scmp.lt.s32.totalorder %s671_s18, 5 }
   0xc   : > { %p186_p9 = pnand %p537_p7, %p185_p8 }
   0xd   : > { %p222_p10 = scmp.lt.s32.totalorder (!%p186_p9), %s722_s19, 3  ;;  %v673_v0 = vmov (!%p186_p9), 0.0   ;;  %vm674_vm0 = vmmov (!%p186_p9), 0   ;;  %vm240_vm1 = vcmask (!%p186_p9), 130048   ;;  %vm318_vm2 = vcmask (!%p186_p9), 64512   ;;  %s219_s12 = sand.u32 (!%p186_p9), 1, %s663_s16  }
   0xe   : > { %189 = sbr.rel (%p186_p9) target bundleno = 770 (0x302), region = 32  ;;  %554 = vmatprep.subr.mxu0 (!%p186_p9), %v673_v0  ;;  %556 = vmatprep.mubr.msk.f32.mxu0 (!%p186_p9), %vm674_vm0, %v673_v0  ;;  %s538_s13 = sshll.u32 (!%p186_p9), %s219_s12, 3 }
   0xf   : > { %559 = vmatprep.subr.mxu1 (!%p186_p9), %v673_v0  ;;  %561 = vmatprep.mubr.msk.f32.mxu1 (!%p186_p9), %vm674_vm0, %v673_v0  ;;  %s221_s14 = scalar_lea.vmem (!%p186_p9), [#allocation2], %s538_s13  ;;  %s547_s20 = sshll.u32 (!%p186_p9), %s722_s19, 7 }
  0x10   : > { %s427_s22 = sshll.u32 (!%p186_p9), %s221_s14, 4  ;;  %s776_s29 = scalar_lea.hbm (!%p186_p9), %s821_s4, %s547_s20  ;;  %s428_s22 = int_to_ptr.vmem [resolvable:$true] %s427_s22 }
  0x11   : > { %s411_s30 = scalar_lea.sflag (!%p186_p9), [#allocation3], %s219_s12  ;;  %s675_s6 = smov (!%p186_p9), [#allocation2]  }
  0x12   : > { %s613_s7 = sshll.u32 (!%p186_p9), %s675_s6, 4  ;;  %s614_s7 = int_to_ptr.vmem [resolvable:$false] %s613_s7 }
  0x13   : > { %p616_p0 = scmp.lt.s32.totalorder (!%p186_p9), %s428_s22, %s614_s7 }
  0x15   : > { %s223_s27 = scalar_select %p222_p10, %s722_s19, 3 }
  0x17   : > { %s751_s28 = sshll.u32 %s223_s27, 3 }
  0x18   : > { %s229_s5 = scalar_lea.vmem %s818_s1, %s751_s28  ;;  %s225_s8 = scalar_lea.vmem %s817_s0, %s751_s28 }
  0x19   : > { %v239_v1 = vld [vmem:[%s229_s5] sm:$0xff]  ;;  %s233_s11 = scalar_lea.vmem %s819_s2, %s751_s28  ;;  %s609_s5 = scalar_lea.vmem %s428_s22, 128 }
  0x1a   : > { %555 = vmatpush3.xpose.msk.msra.mxu0 %vm240_vm1, %v239_v1  ;;  %v238_v2 = vld [vmem:[%s225_s8] sm:$0xff]  ;;  %p610_p11 = scmp.ne.s32.totalorder %s428_s22, %s609_s5  ;;  %s615_s8 = scalar_lea.vmem %s614_s7, 256 }
  0x1b   : > { %v331_v12 = vld [vmem:[%s233_s11] sm:$0xff]  ;;  %p617_p1 = scmp.lt.s32.totalorder %s615_s8, %s609_s5 }
  0x1c   : > { %560 = vmatpush3.msra.mxu1 %v331_v12  ;;  %p611_p12 = pnand %p610_p11, %p739_p5 }
  0x1d   : > { %557 = vmatmul.mubr.msk.f32.vlgmr.msra.gmra.mrb[0].mxu0 %vm240_vm1, %v238_v2  ;;  %p618_p2 = por %p617_p1, %p616_p0 }
  0x1e   : > { %p612_p13 = pneg %p611_p12 }
  0x20   : > { %p619_p3 = pnand %p618_p2, %p612_p13 }
  0xf0   : > { %v313_v3 = vpop.f32.mrb[0].mxu0 }
  0xf1   : > { %v317_v4 = vmul.f32 0.25, %v313_v3  ;;  %v558_v5 = vpop.f32.mrb[1].mxu0 }
  0xf3   : > { %v319_v6 = vsel %vm318_vm2, %v317_v4, -inf }
  0xf4   : > { %320 = vmax.xlane.f32.xlu0 %v319_v6 }
 0x181   : > { %v321_v7 = vpop.xlane.xlu0 %320 }
 0x182   : > { %v322_v8 = vsub.f32 %v317_v4, %v321_v7 }
 0x184   : > { %v323_v9 = vmul.f32 1.442695, %v322_v8 }
 0x186   : > { %605 = vpow2.f32 %v323_v9 }
 0x190   : > { %v606_v10 = vpop.eup %605 }
 0x191   : > { %v325_v11 = vsel %vm318_vm2, %v606_v10, 0.0 }
 0x192   : > { %326 = vadd.xlane.f32.xlu0 %v325_v11 }
 0x21f   : > { %v327_v13 = vpop.xlane.xlu0 %326 }
 0x220   : > { %607 = vrcp.f32 %v327_v13 }
 0x22a   : > { %v608_v14 = vpop.eup %607 }
 0x22b   : > { %v329_v15 = vmul.f32 %v608_v14, %v606_v10 }
 0x22d   : > { %562 = vmatmul.mubr.msk.f32.vlgmr.msra.gmra.mrb[0].mxu1 %vm318_vm2, %v329_v15  ;;  %330 = vst.msk [vmem:[%s221_s14] sm:$0xff] %vm318_vm2, %v329_v15 }
 0x22e   : > { %622 = shalt.err (!%p619_p3)
}
 0x22f   : > { %s623_s19 = scalar_lea.hbm %s776_s29, 128  ;;  %s627_s11 = scalar_lea.hbm %s821_s4, 512 }
 0x230   : > { %p624_p4 = scmp.ne.s32.totalorder %s776_s29, %s623_s19  ;;  %p628_p9 = scmp.lt.u32.totalorder %s776_s29, %s821_s4 }
 0x231   : > { %p629_p10 = scmp.lt.u32.totalorder %s627_s11, %s623_s19  ;;  %p631_p12 = scmp.lt.u32.totalorder %s623_s19, %s776_s29 }
 0x232   : > { %p625_p7 = pnand %p624_p4, %p739_p5 }
 0x233   : > { %p630_p11 = por %p629_p10, %p628_p9 }
 0x234   : > { %p626_p8 = pneg %p625_p7 }
 0x235   : > { %p632_p13 = por %p631_p12, %p630_p11 }
 0x237   : > { %p633_p0 = pnand %p632_p13, %p626_p8 }
 0x239   : > { %636 = shalt.err (!%p633_p0)
}
 0x23a   : > { %564 = dma.vmem_to_hbm [thread:$0]  (%p739_p5), %s428_s22, 128, %s776_s29, %s411_s30  }
 0x23b   : > { %s237_s23 = scalar_lea.vmem %s820_s3, %s751_s28 }
 0x300   : > { %v401_v16 = vpop.f32.mrb[0].mxu1 }
 0x301   : > { %405 = vst.msk [vmem:[%s237_s23] sm:$0xff] %vm240_vm1, %v401_v16  ;;  %v563_v17 = vpop.f32.mrb[1].mxu1 }
 0x302 PF: > { %p570_p1 = scmp.ge.s32.totalorder %s671_s18, 2  ;;  %s446_s27 = sand.u32 1, %s659_s15  }
 0x303   : > { %s447_s25 = scalar_lea.sflag [#allocation3], %s446_s27 }
 0x304   : > { %p567_p2 = pnand %p570_p1, %p743_p6 }
 0x306   : > { %654 = dma.done.wait (!%p567_p2), %s447_s25, 128  }
 0x307   : > { %656 = vsyncadd (!%p567_p2), %s447_s25, 4294967168  ;;  %p15_p5 = scmp.ge.s32.totalorder %s726_s21, 6   ;;  %s824_s15 = smov %s663_s16 }
 0x308   : > { %s825_s16 = smov %s667_s17  ;;  %s826_s17 = smov %s737_s24 }
 0x309   : > { %s827_s18 = smov %s726_s21  ;;  %17 = sbr.rel (!%p15_p5) target bundleno = 3 (0x3), region = 85 }
 0x310   :  { %452 = vsyncpa [#allocation3], 1 }
 0x311   :  { %454 = vsyncpa [#allocation3 + $0x1], 1 }

// kernel: fft_block_forward.3
= control target key start
LH: loop header
LB: loop body
LE: loop exit
PB: predicated region body
PF: predicated region fallthrough
CT: control target
= control target key end

     0   :  { %s1483_s0 = inlined_call_operand.hbm [shape: f32[2,8,32], index: 0, kind: input, shape index: {}]   ;;  %s1484_s1 = inlined_call_operand.hbm [shape: f32[32,32], index: 1, kind: input, shape index: {}]   ;;  %s1485_s2 = inlined_call_operand.hbm [shape: f32[32,32], index: 2, kind: input, shape index: {}]   ;;  %s1486_s3 = inlined_call_operand.hbm [shape: f32[32,32], index: 3, kind: input, shape index: {}]   ;;  %s1487_s4 = inlined_call_operand.vmem [shape: f32[1,32], index: 4, kind: input, shape index: {}]   ;;  %s1488_s5 = inlined_call_operand.vmem [shape: f32[1,32], index: 5, kind: input, shape index: {}]   ;;  %s1489_s6 = inlined_call_operand.vmem [shape: f32[1,32], index: 6, kind: input, shape index: {}]   ;;  %s1490_s7 = inlined_call_operand.vmem [shape: f32[2,8,32], index: 7, kind: output, shape index: {0}]   ;;  %s1491_s8 = inlined_call_operand.vmem [shape: f32[2,8,32], index: 8, kind: output, shape index: {1}]   ;;  %s1492_s9 = inlined_call_operand.vmem [shape: f32[2,8,32], index: 9, kind: output, shape index: {2}]  }
   0x1   :  { %1496 = sst [smem:[#allocation12_spill]] %s1492_s9 }
   0x2   :  { %15 = vsyncpa [#allocation3], 0 }
   0x3   :  { %17 = vsyncpa [#allocation3 + $0x1], 0 }
   0x4   :  { %18 = vsyncpa [#allocation5], 0 }
   0x5   :  { %19 = vsyncpa [#allocation8], 0  ;;  %s1242_s30 = smov 0   ;;  %s1244_s10 = smov 0  }
   0x6   :  { %s1246_s11 = smov 0   ;;  %s1248_s12 = smov 0  }
   0x7 LB: > { %s1261_s13 = sadd.s32 4294967295, %s1181_s12   ;;  %p45_p0 = scmp.ne.s32.totalorder %s1173_s10, %s1169_s30  ;;  %s1181_s12 = sphi %s1248_s12, %s1512_s12   ;;  %s1177_s11 = sphi %s1246_s11, %s1511_s11   ;;  %s1173_s10 = sphi %s1244_s10, %s1510_s10   ;;  %s1169_s30 = sphi %s1242_s30, %s1509_s30  }
   0x8   : > { %p1493_p1 = scmp.eq.s32.totalorder %s1261_s13, 0  ;;  %p853_p2 = scmp.ge.s32.totalorder %s1181_s12, 1 }
   0x9   : > { %p260_p3 = scmp.lt.s32.totalorder %s1181_s12, 3  ;;  %s1183_s16 = smov [#allocation4]  }
   0xa   : > { %p1269_p4 = por %p1493_p1, %p45_p0  ;;  %s272_s17 = sshll.u32 %s1183_s16, 4  ;;  %s1277_s17 = int_to_ptr.vmem [resolvable:$true] %s272_s17 }
   0xb   : > { %p1273_p5 = pnand %p853_p2, %p260_p3  ;;  %s1184_s19 = smov [#allocation6]  }
   0xc   : > { %s1497_s14 = scalar_select %p1269_p4, 1, 0 }
   0xd   : > { %s1498_s15 = scalar_select %p1273_p5, 1, 0 }
   0xe   : > { %p956_p6 = pneg %p1273_p5  ;;  %s285_s20 = sshll.u32 %s1184_s19, 4  ;;  %s1287_s20 = int_to_ptr.vmem [resolvable:$true] %s285_s20 }
   0xf   : > { %s1185_s21 = smov [#allocation7]   ;;  %s1025_s25 = scalar_lea.hbm %s1484_s1, 512 }
  0x10   : > { %p1283_p7 = pnand %p956_p6, %p1493_p1  ;;  %s1289_s22 = sshll.u32 %s1185_s21, 4  ;;  %s299_s22 = int_to_ptr.vmem [resolvable:$true] %s1289_s22 }
  0x11   : > { %p1026_p8 = scmp.ne.s32.totalorder %s1484_s1, %s1025_s25  ;;  %p1032_p12 = scmp.lt.u32.totalorder %s1025_s25, %s1484_s1 }
  0x12   : > { %p1299_p9 = pneg %p1283_p7 }
  0x14   : > { %p1028_p10 = pnand %p1299_p9, %p1026_p8 }
  0x16   : > { %p1029_p11 = pneg %p1028_p10 }
  0x18   : > { %p1034_p13 = pnand %p1032_p12, %p1029_p11 }
  0x1a   : > { %1037 = shalt.err (!%p1034_p13)
}
  0x1b   : > { %s1038_s16 = scalar_lea.vmem %s1277_s17, 512  ;;  %p1046_p6 = scmp.lt.s32.totalorder %s1277_s17, %s1277_s17 }
  0x1c   : > { %p1039_p0 = scmp.ne.s32.totalorder %s1277_s17, %s1038_s16  ;;  %p1047_p1 = scmp.lt.s32.totalorder %s1038_s16, %s1038_s16 }
  0x1e   : > { %p1041_p2 = pnand %p1039_p0, %p1299_p9  ;;  %p1048_p8 = por %p1047_p1, %p1046_p6 }
  0x20   : > { %p1042_p3 = pneg %p1041_p2 }
  0x22   : > { %p1049_p10 = pnand %p1048_p8, %p1042_p3 }
  0x24   : > { %1052 = shalt.err (!%p1049_p10)
}
  0x25   : > { %s1186_s19 = smov 128   ;;  %s1187_s21 = smov 8  }
  0x26   : > { %959 = dma.hbm_to_vmem [thread:$0]  (!%p1283_p7), %s1484_s1, 512, %s1277_s17, [#allocation5], %s1186_s19, %s1186_s19, %s1187_s21  }
  0x27   : > { %s1053_s27 = scalar_lea.hbm %s1485_s2, 512 }
  0x28   : > { %p1054_p1 = scmp.ne.s32.totalorder %s1485_s2, %s1053_s27  ;;  %p1060_p13 = scmp.lt.u32.totalorder %s1053_s27, %s1485_s2 }
  0x2a   : > { %p1056_p11 = pnand %p1054_p1, %p1299_p9 }
  0x2c   : > { %p1057_p12 = pneg %p1056_p11 }
  0x2e   : > { %p1062_p0 = pnand %p1060_p13, %p1057_p12 }
  0x30   : > { %1065 = shalt.err (!%p1062_p0)
}
  0x31   : > { %s1066_s17 = scalar_lea.vmem %s1287_s20, 512  ;;  %p1074_p8 = scmp.lt.s32.totalorder %s1287_s20, %s1287_s20 }
  0x32   : > { %p1067_p2 = scmp.ne.s32.totalorder %s1287_s20, %s1066_s17  ;;  %p1075_p10 = scmp.lt.s32.totalorder %s1066_s17, %s1066_s17 }
  0x34   : > { %p1069_p3 = pnand %p1067_p2, %p1299_p9  ;;  %p1076_p1 = por %p1075_p10, %p1074_p8 }
  0x36   : > { %p1070_p6 = pneg %p1069_p3 }
  0x38   : > { %p1077_p11 = pnand %p1076_p1, %p1070_p6 }
  0x3a   : > { %1080 = shalt.err (!%p1077_p11)
}
  0x3b   : > { %962 = dma.hbm_to_vmem [thread:$0]  (!%p1283_p7), %s1485_s2, 512, %s1287_s20, [#allocation5], %s1186_s19, %s1186_s19, %s1187_s21  }
  0x3c   : > { %s1081_s26 = scalar_lea.hbm %s1486_s3, 512 }
  0x3d   : > { %p1082_p12 = scmp.ne.s32.totalorder %s1486_s3, %s1081_s26  ;;  %p1088_p2 = scmp.lt.u32.totalorder %s1081_s26, %s1486_s3 }
  0x3f   : > { %p1084_p13 = pnand %p1082_p12, %p1299_p9 }
  0x41   : > { %p1085_p0 = pneg %p1084_p13 }
  0x43   : > { %p1090_p3 = pnand %p1088_p2, %p1085_p0 }
  0x45   : > { %1093 = shalt.err (!%p1090_p3)
}
  0x46   : > { %s1094_s17 = scalar_lea.vmem %s299_s22, 512  ;;  %p1102_p1 = scmp.lt.s32.totalorder %s299_s22, %s299_s22 }
  0x47   : > { %p1095_p6 = scmp.ne.s32.totalorder %s299_s22, %s1094_s17  ;;  %p1103_p11 = scmp.lt.s32.totalorder %s1094_s17, %s1094_s17 }
  0x49   : > { %p1097_p8 = pnand %p1095_p6, %p1299_p9  ;;  %p1104_p4 = por %p1103_p11, %p1102_p1 }
  0x4b   : > { %p1098_p10 = pneg %p1097_p8 }
  0x4d   : > { %p1105_p5 = pnand %p1104_p4, %p1098_p10 }
  0x4f   : > { %1108 = shalt.err (!%p1105_p5)
}
  0x50   : > { %965 = dma.hbm_to_vmem [thread:$0]  (!%p1283_p7), %s1486_s3, 512, %s299_s22, [#allocation8], %s1186_s19, %s1186_s19, %s1187_s21  }
  0x51   : > { %s1372_s28 = sadd.s32 1, %s1181_s12   ;;  %s32_s23 = sadd.s32 1, %s1177_s11 }
  0x52   : > { %s29_s18 = ssub.s32 %s1181_s12, %s1372_s28  ;;  %p39_p5 = scmp.ne.s32.totalorder %s1177_s11, %s1173_s10 }
  0x53   : > { %p30_p4 = scmp.eq.s32.totalorder %s29_s18, 0  ;;  %p40_p9 = scmp.eq.s32.totalorder %s1181_s12, 0 }
  0x54   : > { %p973_p12 = scmp.lt.s32.totalorder %s1181_s12, 2  ;;  %s321_s25 = sand.u32 1, %s1177_s11  }
  0x55   : > { %s1382_s24 = scalar_select %p30_p4, %s1177_s11, %s32_s23  }
  0x56   : > { %p41_p13 = por %p40_p9, %p39_p5  ;;  %s858_s26 = sshll.u32 %s321_s25, 3 }
  0x57   : > { %s859_s27 = sshll.u32 %s1181_s12, 7  ;;  %s325_s22 = scalar_lea.vmem [#allocation2], %s858_s26 }
  0x58   : > { %s1389_s16 = scalar_lea.hbm %s1483_s0, %s859_s27  ;;  %s332_s19 = sshll.u32 %s325_s22, 4  ;;  %s1391_s19 = int_to_ptr.vmem [resolvable:$true] %s332_s19 }
  0x59   : > { %p1393_p7 = pnand %p973_p12, %p41_p13  ;;  %s322_s12 = scalar_lea.sflag [#allocation3], %s321_s25 }
  0x5a   : > { %s1109_s17 = scalar_lea.hbm %s1389_s16, 128  ;;  %s1114_s18 = scalar_lea.hbm %s1483_s0, 256 }
  0x5b   : > { %p1110_p0 = scmp.ne.s32.totalorder %s1389_s16, %s1109_s17  ;;  %p1111_p2 = pneg %p1393_p7 }
  0x5c   : > { %p1115_p8 = scmp.lt.u32.totalorder %s1389_s16, %s1483_s0  ;;  %p1116_p10 = scmp.lt.u32.totalorder %s1114_s18, %s1109_s17 }
  0x5d   : > { %p1112_p3 = pnand %p1111_p2, %p1110_p0  ;;  %p1118_p11 = scmp.lt.u32.totalorder %s1109_s17, %s1389_s16 }
  0x5e   : > { %p1117_p1 = por %p1116_p10, %p1115_p8 }
  0x5f   : > { %p1113_p6 = pneg %p1112_p3 }
  0x60   : > { %p1119_p4 = por %p1118_p11, %p1117_p1 }
  0x62   : > { %p1120_p5 = pnand %p1119_p4, %p1113_p6 }
  0x64   : > { %1123 = shalt.err (!%p1120_p5)
}
  0x65   : > { %s1124_s25 = scalar_lea.vmem %s1391_s19, 128  ;;  %s1188_s27 = smov [#allocation2]  }
  0x66   : > { %p1125_p9 = scmp.ne.s32.totalorder %s1391_s19, %s1124_s25  ;;  %s1129_s29 = sshll.u32 %s1188_s27, 4  ;;  %s1130_s29 = int_to_ptr.vmem [resolvable:$false] %s1129_s29 }
  0x67   : > { %s1131_s30 = scalar_lea.vmem %s1130_s29, 256  ;;  %p1132_p0 = scmp.lt.s32.totalorder %s1391_s19, %s1130_s29 }
  0x68   : > { %p1127_p12 = pnand %p1125_p9, %p1111_p2  ;;  %p1133_p3 = scmp.lt.s32.totalorder %s1131_s30, %s1124_s25 }
  0x6a   : > { %p1128_p13 = pneg %p1127_p12  ;;  %p1134_p8 = por %p1133_p3, %p1132_p0 }
  0x6c   : > { %p1135_p10 = pnand %p1134_p8, %p1128_p13 }
  0x6e   : > { %1138 = shalt.err (!%p1135_p10)
}
  0x6f   : > { %969 = dma.hbm_to_vmem [thread:$0]  (!%p1393_p7), %s1389_s16, 128, %s1391_s19, %s322_s12  }
  0x70   : > { %p1502_p6 = scmp.ne.s32.totalorder %s1498_s15, 0 }
  0x71   : > { %s343_s22 = sand.u32 (!%p1502_p6), 1, %s1173_s10   ;;  %p1503_p2 = scmp.ne.s32.totalorder (!%p1502_p6), %s1497_s14, 0 }
  0x72   : > { %341 = sbr.rel (%p1502_p6) target bundleno = 676 (0x2a4), region = 48  ;;  %s861_s17 = sshll.u32 (!%p1502_p6), %s343_s22, 3 }
  0x73   : > { %s344_s20 = scalar_lea.sflag (!%p1502_p6), [#allocation3], %s343_s22  ;;  %s347_s9 = scalar_lea.vmem (!%p1502_p6), [#allocation2], %s861_s17 }
  0x79   : > { %1156 = dma.done.wait (%p1503_p2), %s344_s20, 128  }
  0x7a   : > { %1158 = vsyncadd (%p1503_p2), %s344_s20, 4294967168  ;;  %p1504_p1 = scmp.eq.s32.totalorder %s1261_s13, 0 }
  0x7c   : > { %1160 = dma.done.wait (%p1504_p1), [#allocation5], 1024   ;;  %p1505_p11 = pmov %p1504_p1 }
  0x7d   : > { %p1506_p7 = pmov %p1504_p1 }
  0x7e   : > { %1162 = vsyncadd (%p1505_p11), [#allocation5], 4294966272 }
  0x7f   : > { %1164 = dma.done.wait (%p1506_p7), [#allocation8], 512   ;;  %p1507_p4 = pmov %p1504_p1 }
  0x80   : > { %v413_v0 = vld [vmem:[%s347_s9] sm:$0xff]  ;;  %vm415_vm0 = vcmask 261120   ;;  %v423_v3 = vld [vmem:[#allocation4] sm:$0xff]  ;;  %v424_v4 = vld [vmem:[#allocation4 + $0x8] sm:$0xff]  ;;  %v1189_v8 = vmov 0.0|0.0   ;;  %vm1190_vm1 = vmmov 0  }
  0x81   : > { %1166 = vsyncadd (%p1507_p4), [#allocation8], 4294966784  ;;  %v414_v1 = vmul.f32 %v413_v0, %v413_v0  ;;  %v925_v5 = vpack.c.bf16 %v424_v4, %v423_v3  ;;  %v507_v6 = vld [vmem:[#allocation6] sm:$0xff]  ;;  %v508_v7 = vld [vmem:[#allocation6 + $0x8] sm:$0xff]  ;;  %924 = vmatprep.subr.bf16.mxu0 %v1189_v8  ;;  %930 = vmatprep.subr.bf16.mxu1 %v1189_v8  ;;  %v1191_v16 = vmov 0.0   ;;  %p401_p5 = scmp.lt.s32.totalorder %s1261_s13, 1 }
  0x82   : > { %v931_v9 = vpack.c.bf16 %v508_v7, %v507_v6  ;;  %v425_v10 = vld [vmem:[#allocation4 + $0x10] sm:$0xff]  ;;  %v426_v11 = vld [vmem:[#allocation4 + $0x18] sm:$0xff]  ;;  %899 = vmatprep.mubr.msk.f32.mxu0 %vm1190_vm1, %v1191_v16  ;;  %910 = vmatprep.mubr.msk.f32.mxu1 %vm1190_vm1, %v1191_v16  ;;  %v588_v19 = vld [vmem:[#allocation7] sm:$0xff]  ;;  %s1508_s17 = sld [smem:[#allocation12_spill]] }
  0x83   : > { %v416_v2 = vsel %vm415_vm0, %v414_v1, 0.0  ;;  %926 = vmatpush3.bf16.msra.mxu0 %v925_v5  ;;  %v928_v12 = vpack.c.bf16 %v426_v11, %v425_v10  ;;  %v509_v13 = vld [vmem:[#allocation6 + $0x10] sm:$0xff]  ;;  %v510_v14 = vld [vmem:[#allocation6 + $0x18] sm:$0xff]  ;;  %v589_v20 = vld [vmem:[#allocation7 + $0x8] sm:$0xff]  ;;  %s1514_s13 = smov (!%p401_p5, %s1261_s13), 1 }
  0x84   : > { %417 = vadd.xlane.f32.xlu0 %v416_v2  ;;  %932 = vmatpush3.bf16.msra.mxu1 %v931_v9  ;;  %v934_v15 = vpack.c.bf16 %v510_v14, %v509_v13  ;;  %v937_v23 = vpack.c.bf16 %v589_v20, %v588_v19  ;;  %v590_v25 = vld [vmem:[#allocation7 + $0x10] sm:$0xff]  ;;  %v591_v26 = vld [vmem:[#allocation7 + $0x18] sm:$0xff]  ;;  %s865_s18 = sshll.u32 %s1514_s13, 3 }
  0x85   : > { %927 = vmatprep.subr.bf16.mxu0 %v1189_v8  ;;  %933 = vmatprep.subr.bf16.mxu1 %v1189_v8  ;;  %v940_v27 = vpack.c.bf16 %v591_v26, %v590_v25  ;;  %v868_v28 = vld [vmem:[%s1487_s4] ss:$0 sm:$0xff]  ;;  %s408_s25 = scalar_lea.vmem %s1491_s8, %s865_s18  ;;  %s404_s30 = scalar_lea.vmem %s1490_s7, %s865_s18 }
  0x86   : > { %v870_v29 = vld [vmem:[%s1488_s5] ss:$0 sm:$0xff] }
  0x87   : > { %929 = vmatpush3.bf16.msra.mxu0 %v928_v12  ;;  %v872_v40 = vld [vmem:[%s1489_s6] ss:$0 sm:$0xff] }
  0x88   : > { %935 = vmatpush3.bf16.msra.mxu1 %v934_v15  ;;  %936 = vmatprep.subr.bf16.mxu0 %v1189_v8  ;;  %s412_s20 = scalar_lea.vmem %s1508_s17, %s865_s18 }
 0x111   : > { %v418_v17 = vpop.xlane.xlu0 %417 }
 0x112   : > { %v419_v18 = vmax.f32 %v418_v17, 1e-10 }
 0x114   : > { %1017 = vrsqrt.f32 %v419_v18 }
 0x11e   : > { %v1018_v21 = vpop.eup %1017 }
 0x11f   : > { %v421_v22 = vmul.f32 5.656854, %v1018_v21 }
 0x121   : > { %v422_v24 = vmul.f32 %v421_v22, %v413_v0 }
 0x123   : > { %900 = vmatmul.mubr.msk.f32.vlgmr.msra.gmra.mrb[0].mxu0 %vm415_vm0, %v422_v24  ;;  %911 = vmatmul.mubr.msk.f32.vlgmr.msra.gmra.mrb[0].mxu1 %vm415_vm0, %v422_v24 }
 0x124   : > { %938 = vmatpush3.bf16.msra.mxu0 %v937_v23  ;;  %921 = vmatprep.mubr.msk.f32.mxu0 %vm1190_vm1, %v1191_v16 }
 0x125   : > { %939 = vmatprep.subr.bf16.mxu0 %v1189_v8 }
 0x128   : > { %941 = vmatpush3.bf16.msra.mxu0 %v940_v27 }
 0x12b   : > { %922 = vmatmul.mubr.msk.f32.vlgmr.msra.gmra.mrb[2].mxu0 %vm415_vm0, %v422_v24 }
 0x1f6   : > { %v503_v30 = vpop.f32.mrb[0].mxu0  ;;  %v584_v31 = vpop.f32.mrb[0].mxu1 }
 0x1f7   : > { %v504_v32 = vadd.f32 %v868_v28, %v503_v30  ;;  %v585_v33 = vadd.f32 %v870_v29, %v584_v31  ;;  %v901_v34 = vpop.f32.mrb[1].mxu0  ;;  %v912_v35 = vpop.f32.mrb[1].mxu1 }
 0x1f9   : > { %v678_v36 = vmul.f32 %v585_v33, %v585_v33  ;;  %v669_v37 = vmul.f32 %v504_v32, %v504_v32 }
 0x1fb   : > { %v679_v38 = vsel %vm415_vm0, %v678_v36, 0.0  ;;  %v670_v39 = vsel %vm415_vm0, %v669_v37, 0.0 }
 0x1fc   : > { %680 = vadd.xlane.f32.xlu1 %v679_v38  ;;  %671 = vadd.xlane.f32.xlu0 %v670_v39 }
 0x1fe   : > { %v665_v41 = vpop.f32.mrb[2].mxu0 }
 0x1ff   : > { %v666_v42 = vadd.f32 %v872_v40, %v665_v41  ;;  %v923_v43 = vpop.f32.mrb[3].mxu0 }
 0x201   : > { %v687_v44 = vmul.f32 %v666_v42, %v666_v42 }
 0x203   : > { %v688_v45 = vsel %vm415_vm0, %v687_v44, 0.0 }
 0x204   : > { %689 = vadd.xlane.f32.xlu1 %v688_v45 }
 0x289   : > { %v681_v46 = vpop.xlane.xlu1 %680  ;;  %v672_v47 = vpop.xlane.xlu0 %671 }
 0x28a   : > { %v682_v48 = vmax.f32 %v681_v46, 1e-10  ;;  %v673_v49 = vmax.f32 %v672_v47, 1e-10 }
 0x28c   : > { %1019 = vrsqrt.f32 %v682_v48 }
 0x28d   : > { %1021 = vrsqrt.f32 %v673_v49 }
 0x291   : > { %v690_v50 = vpop.xlane.xlu1 %689 }
 0x292   : > { %v691_v51 = vmax.f32 %v690_v50, 1e-10 }
 0x294   : > { %1023 = vrsqrt.f32 %v691_v51 }
 0x296   : > { %v1020_v52 = vpop.eup %1019 }
 0x297   : > { %v1022_v53 = vpop.eup %1021  ;;  %v684_v54 = vmul.f32 5.656854, %v1020_v52 }
 0x298   : > { %v675_v55 = vmul.f32 5.656854, %v1022_v53 }
 0x299   : > { %v685_v56 = vmul.f32 %v684_v54, %v585_v33 }
 0x29a   : > { %v676_v57 = vmul.f32 %v675_v55, %v504_v32 }
 0x29b   : > { %686 = vst.msk [vmem:[%s408_s25] sm:$0xff] %vm415_vm0, %v685_v56 }
 0x29c   : > { %677 = vst.msk [vmem:[%s404_s30] sm:$0xff] %vm415_vm0, %v676_v57 }
 0x29e   : > { %v1024_v58 = vpop.eup %1023 }
 0x29f   : > { %v693_v59 = vmul.f32 5.656854, %v1024_v58 }
 0x2a1   : > { %v694_v60 = vmul.f32 %v693_v59, %v666_v42 }
 0x2a3   : > { %695 = vst.msk [vmem:[%s412_s20] sm:$0xff] %vm415_vm0, %v694_v60 }
 0x2a4 PF: > { %p22_p9 = scmp.ge.s32.totalorder %s1372_s28, 4   ;;  %s1509_s30 = smov %s1173_s10 }
 0x2a5   : > { %s1510_s10 = smov %s1177_s11  ;;  %s1511_s11 = smov %s1382_s24 }
 0x2a6   : > { %s1512_s12 = smov %s1372_s28  ;;  %24 = sbr.rel (!%p22_p9) target bundleno = 7 (0x7), region = 124 }
 0x2ad   :  { %743 = vsyncpa [#allocation3], 1 }
 0x2ae   :  { %745 = vsyncpa [#allocation3 + $0x1], 1 }
 0x2af   :  { %746 = vsyncpa [#allocation5], 1 }
 0x2b0   :  { %747 = vsyncpa [#allocation8], 1 }

// kernel: fft_block_forward.5
= control target key start
LH: loop header
LB: loop body
LE: loop exit
PB: predicated region body
PF: predicated region fallthrough
CT: control target
= control target key end

     0   :  { %11 = vsyncpa [#allocation5], 0  ;;  %s1254_s0 = inlined_call_operand.vmem [shape: f32[2,8,32], index: 0, kind: input, shape index: {}]   ;;  %s1255_s1 = inlined_call_operand.vmem [shape: f32[2,8,32], index: 1, kind: input, shape index: {}]   ;;  %s1256_s2 = inlined_call_operand.vmem [shape: f32[288,64], index: 2, kind: input, shape index: {}]   ;;  %s1257_s3 = inlined_call_operand.vmem [shape: f32[1,64], index: 3, kind: input, shape index: {}]   ;;  %s1258_s4 = inlined_call_operand.vmem [shape: f32[64,32], index: 4, kind: input, shape index: {}]   ;;  %s1259_s5 = inlined_call_operand.vmem [shape: f32[1,32], index: 5, kind: input, shape index: {}]   ;;  %s1260_s6 = inlined_call_operand.hbm [shape: f32[2,8,32], index: 6, kind: output, shape index: {}]  }
   0x1   :  { %13 = vsyncpa [#allocation5 + $0x1], 0  ;;  %s988_s21 = smov 0   ;;  %s990_s22 = smov 0  }
   0x2   :  { %s992_s23 = smov 0   ;;  %s994_s24 = smov 0  }
   0x3 LB: > { %s1009_s25 = sadd.s32 4294967295, %s944_s24   ;;  %s691_s26 = sadd.s32 4294967294, %s944_s24   ;;  %s944_s24 = sphi %s994_s24, %s1266_s24   ;;  %s940_s23 = sphi %s992_s23, %s1265_s23   ;;  %s936_s22 = sphi %s990_s22, %s1264_s22   ;;  %s932_s21 = sphi %s988_s21, %s1263_s21  }
   0x4   : > { %s1013_s27 = sadd.s32 1, %s944_s24   ;;  %s162_s28 = sadd.s32 1, %s940_s23 }
   0x5   : > { %s159_s29 = ssub.s32 %s944_s24, %s1013_s27  ;;  %p172_p0 = scmp.ne.s32.totalorder %s940_s23, %s936_s22 }
   0x6   : > { %p160_p1 = scmp.eq.s32.totalorder %s159_s29, 0  ;;  %p173_p2 = scmp.eq.s32.totalorder %s1009_s25, 1 }
   0x7   : > { %p178_p3 = scmp.ne.s32.totalorder %s936_s22, %s932_s21  ;;  %p179_p4 = scmp.eq.s32.totalorder %s691_s26, 1 }
   0x8   : > { %s1024_s30 = scalar_select %p160_p1, %s940_s23, %s162_s28  }
   0x9   : > { %p1026_p5 = por %p173_p2, %p172_p0  ;;  %p1030_p6 = por %p179_p4, %p178_p3 }
   0xa   : > { %p694_p7 = scmp.ge.s32.totalorder %s944_s24, 1  ;;  %p223_p8 = scmp.lt.s32.totalorder %s944_s24, 3 }
   0xc   : > { %p224_p9 = pnand %p694_p7, %p223_p8 }
   0xd   : > { %p256_p10 = scmp.lt.s32.totalorder (!%p224_p9), %s1009_s25, 1  ;;  %vm271_vm0 = vcmask (!%p224_p9), 261120   ;;  %vm267_vm1 = vcmask (!%p224_p9), 257024   ;;  %v946_v5 = vmov (!%p224_p9), 0.0   ;;  %v947_v6 = vmov (!%p224_p9), 0.0|0.0   ;;  %v360_v7 = vld [vmem:[%s1256_s2 + $0x100] sm:$0xff] (!%p224_p9) }
   0xe   : > { %227 = sbr.rel (%p224_p9) target bundleno = 790 (0x316), region = 44  ;;  %269 = vst.msk [vmem:[#allocation2 + $0xc] sm:$0xf] (!%p224_p9), %vm267_vm1, %v946_v5  ;;  %268 = vst.msk [vmem:[#allocation2] sm:$0xf] (!%p224_p9), %vm267_vm1, %v946_v5  ;;  %817 = vmatprep.subr.bf16.mxu1 (!%p224_p9), %v947_v6  ;;  %v361_v8 = vld [vmem:[%s1256_s2 + $0x108] sm:$0xff] (!%p224_p9) }
   0xf   : > { %v818_v9 = vpack.c.bf16 (!%p224_p9), %v361_v8, %v360_v7  ;;  %v362_v10 = vld [vmem:[%s1256_s2 + $0x110] sm:$0xff] (!%p224_p9)  ;;  %v363_v11 = vld [vmem:[%s1256_s2 + $0x118] sm:$0xff] (!%p224_p9)  ;;  %vm948_vm2 = vmmov (!%p224_p9), 0   ;;  %v344_v13 = vld [vmem:[%s1256_s2 + $0x80] sm:$0xff] (!%p224_p9)  ;;  %s950_s28 = smov (!%p224_p9), 64   ;;  %vm287_vm3 = vcmask (!%p224_p9), 523520  }
  0x10   : > { %v821_v12 = vpack.c.bf16 (!%p224_p9), %v363_v11, %v362_v10  ;;  %763 = vmatprep.mubr.msk.f32.mxu1 (!%p224_p9), %vm948_vm2, %v946_v5  ;;  %v345_v14 = vld [vmem:[%s1256_s2 + $0x88] sm:$0xff] (!%p224_p9)  ;;  %v328_v15 = vld [vmem:[%s1256_s2] sm:$0xff] (!%p224_p9)  ;;  %v346_v18 = vld [vmem:[%s1256_s2 + $0x90] sm:$0xff] (!%p224_p9)  ;;  %vm294_vm4 = vcmask (!%p224_p9), 785920   ;;  %vm301_vm5 = vcmask (!%p224_p9), 1048320   ;;  %vm530_vm6 = vcmask (!%p224_p9), 523264  }
  0x11   : > { %819 = vmatpush3.bf16.msra.mxu1 (!%p224_p9), %v818_v9  ;;  %v785_v16 = vpack.c.bf16 (!%p224_p9), %v345_v14, %v344_v13  ;;  %v329_v17 = vld [vmem:[%s1256_s2 + $0x8] sm:$0xff] (!%p224_p9)  ;;  %v347_v19 = vld [vmem:[%s1256_s2 + $0x98] sm:$0xff] (!%p224_p9)  ;;  %v330_v22 = vld [vmem:[%s1256_s2 + $0x10] sm:$0xff] (!%p224_p9)  ;;  %s253_s20 = sand.u32 (!%p224_p9), 1, %s936_s22  }
  0x12   : > { %820 = vmatprep.subr.bf16.mxu1 (!%p224_p9), %v947_v6  ;;  %v787_v20 = vpack.c.bf16 (!%p224_p9), %v329_v17, %v328_v15  ;;  %v789_v21 = vpack.c.bf16 (!%p224_p9), %v347_v19, %v346_v18  ;;  %v331_v23 = vld [vmem:[%s1256_s2 + $0x18] sm:$0xff] (!%p224_p9)  ;;  %v348_v27 = vld [vmem:[%s1256_s2 + $0xa0] sm:$0xff] (!%p224_p9)  ;;  %v349_v28 = vld [vmem:[%s1256_s2 + $0xa8] sm:$0xff] (!%p224_p9)  ;;  %s695_s26 = sshll.u32 (!%p224_p9), %s253_s20, 3  ;;  %s607_s15 = scalar_lea.sflag (!%p224_p9), [#allocation5], %s253_s20 }
  0x13   : > { %786 = vmatprep.subr.bf16.mxu0 (!%p224_p9), %v785_v16  ;;  %v791_v24 = vpack.c.bf16 (!%p224_p9), %v331_v23, %v330_v22  ;;  %v793_v30 = vpack.c.bf16 (!%p224_p9), %v349_v28, %v348_v27  ;;  %v332_v31 = vld [vmem:[%s1256_s2 + $0x20] sm:$0xff] (!%p224_p9)  ;;  %v333_v32 = vld [vmem:[%s1256_s2 + $0x28] sm:$0xff] (!%p224_p9)  ;;  %v350_v36 = vld [vmem:[%s1256_s2 + $0xb0] sm:$0xff] (!%p224_p9) }
  0x14   : > { %788 = vmatpush3.bf16.msra.mxu0 (!%p224_p9), %v787_v20  ;;  %v795_v34 = vpack.c.bf16 (!%p224_p9), %v333_v32, %v332_v31  ;;  %v351_v37 = vld [vmem:[%s1256_s2 + $0xb8] sm:$0xff] (!%p224_p9)  ;;  %v334_v39 = vld [vmem:[%s1256_s2 + $0x30] sm:$0xff] (!%p224_p9)  ;;  %v352_v42 = vld [vmem:[%s1256_s2 + $0xc0] sm:$0xff] (!%p224_p9) }
  0x15   : > { %s257_s9 = scalar_select %p256_p10, %s1009_s25, 1  ;;  %822 = vmatpush3.bf16.msra.mxu1 %v821_v12  ;;  %790 = vmatprep.subr.bf16.mxu0 %v789_v21  ;;  %v797_v38 = vpack.c.bf16 %v351_v37, %v350_v36  ;;  %v335_v40 = vld [vmem:[%s1256_s2 + $0x38] sm:$0xff]  ;;  %v353_v43 = vld [vmem:[%s1256_s2 + $0xc8] sm:$0xff]  ;;  %v336_v45 = vld [vmem:[%s1256_s2 + $0x40] sm:$0xff] }
  0x16   : > { %823 = vmatprep.subr.bf16.mxu1 %v947_v6  ;;  %v799_v41 = vpack.c.bf16 %v335_v40, %v334_v39  ;;  %v801_v44 = vpack.c.bf16 %v353_v43, %v352_v42  ;;  %v337_v46 = vld [vmem:[%s1256_s2 + $0x48] sm:$0xff]  ;;  %v354_v48 = vld [vmem:[%s1256_s2 + $0xd0] sm:$0xff]  ;;  %v355_v49 = vld [vmem:[%s1256_s2 + $0xd8] sm:$0xff] }
  0x17   : > { %s696_s10 = sshll.u32 %s257_s9, 3  ;;  %v803_v47 = vpack.c.bf16 %v337_v46, %v336_v45  ;;  %v805_v52 = vpack.c.bf16 %v355_v49, %v354_v48  ;;  %s949_s9 = smov 32   ;;  %v338_v57 = vld [vmem:[%s1256_s2 + $0x50] sm:$0xff]  ;;  %v339_v58 = vld [vmem:[%s1256_s2 + $0x58] sm:$0xff]  ;;  %v356_v59 = vld [vmem:[%s1256_s2 + $0xe0] sm:$0xff] }
  0x18   : > { %s259_s13 = scalar_lea.vmem %s1254_s0, %s696_s10  ;;  %s263_s16 = scalar_lea.vmem %s1255_s1, %s696_s10  ;;  %792 = vmatpush3.bf16.msra.mxu0 %v791_v24  ;;  %v807_v60 = vpack.c.bf16 %v339_v58, %v338_v57  ;;  %v357_v61 = vld [vmem:[%s1256_s2 + $0xe8] sm:$0xff]  ;;  %v340_v62 = vld [vmem:[%s1256_s2 + $0x60] sm:$0xff]  ;;  %v342_v9 = vld [vmem:[%s1256_s2 + $0x70] sm:$0xff] }
  0x19   : > { %v264_v0 = vld [vmem:[%s259_s13] sm:$0xff]  ;;  %794 = vmatprep.subr.bf16.mxu0 %v793_v30  ;;  %v341_v63 = vld [vmem:[%s1256_s2 + $0x68] sm:$0xff]  ;;  %v343_v10 = vld [vmem:[%s1256_s2 + $0x78] sm:$0xff]  ;;  %s255_s10 = scalar_lea.vmem [#allocation4], %s695_s26 }
  0x1a   : > { %v265_v1 = vld [vmem:[%s263_s16] sm:$0xff]  ;;  %v815_v12 = vpack.c.bf16 %v343_v10, %v342_v9  ;;  %s951_s16 = smov 96   ;;  %v516_v16 = vld [vmem:[%s1258_s4 + $0x8] sm:$0xff]  ;;  %v517_v17 = vld [vmem:[%s1258_s4 + $0x10] sm:$0xff]  ;;  %s620_s11 = sshll.u32 %s255_s10, 4  ;;  %s1213_s11 = int_to_ptr.vmem [resolvable:$true] %s620_s11 }
  0x1b   : > { %v1044_v2 = vadd.f32 %v265_v1, %v264_v0  ;;  %v809_v0 = vpack.c.bf16 %v357_v61, %v356_v59  ;;  %v358_v1 = vld [vmem:[%s1256_s2 + $0xf0] sm:$0xff]  ;;  %v515_v15 = vld [vmem:[%s1258_s4] sm:$0xff]  ;;  %v520_v31 = vld [vmem:[%s1258_s4 + $0x28] sm:$0xff] }
  0x1c   : > { %796 = vmatpush3.bf16.msra.mxu0 %v795_v34  ;;  %v824_v18 = vpack.c.bf16 %v516_v16, %v515_v15  ;;  %v519_v30 = vld [vmem:[%s1258_s4 + $0x20] sm:$0xff]  ;;  %v522_v34 = vld [vmem:[%s1258_s4 + $0x38] sm:$0xff] }
  0x1d   : > { %v270_v3 = vmul.f32 %v1044_v2, %v1044_v2  ;;  %798 = vmatprep.subr.bf16.mxu0 %v797_v38  ;;  %v830_v32 = vpack.c.bf16 %v520_v31, %v519_v30  ;;  %v698_v37 = vld [vmem:[%s1257_s3] ss:$0 sm:$0xff] }
  0x1e   : > { %v700_v42 = vld [vmem:[%s1259_s5] ss:$0 sm:$0xff] }
  0x1f   : > { %v272_v4 = vsel %vm271_vm0, %v270_v3, 0.0  ;;  %v359_v3 = vld [vmem:[%s1256_s2 + $0xf8] sm:$0xff] }
  0x20   : > { %273 = vadd.xlane.f32.xlu0 %v272_v4  ;;  %800 = vmatpush3.bf16.msra.mxu0 %v799_v41  ;;  %v811_v4 = vpack.c.bf16 %v341_v63, %v340_v62  ;;  %v813_v7 = vpack.c.bf16 %v359_v3, %v358_v1 }
  0x21   : > { %802 = vmatprep.subr.bf16.mxu0 %v801_v44 }
  0x24   : > { %804 = vmatpush3.bf16.msra.mxu0 %v803_v47 }
  0x25   : > { %806 = vmatprep.subr.bf16.mxu0 %v805_v52 }
  0x28   : > { %808 = vmatpush3.bf16.msra.mxu0 %v807_v60 }
  0x29   : > { %810 = vmatprep.subr.bf16.mxu0 %v809_v0 }
  0x2c   : > { %812 = vmatpush3.bf16.msra.mxu0 %v811_v4 }
  0x2d   : > { %814 = vmatprep.subr.bf16.mxu0 %v813_v7 }
  0x30   : > { %816 = vmatpush3.bf16.msra.mxu0 %v815_v12 }
  0xad   : > { %v274_v25 = vpop.xlane.xlu0 %273 }
  0xae   : > { %v275_v26 = vmax.f32 %v274_v25, 1e-10 }
  0xb0   : > { %880 = vrsqrt.f32 %v275_v26 }
  0xba   : > { %v881_v29 = vpop.eup %880 }
  0xbb   : > { %v277_v33 = vmul.f32 5.656854, %v881_v29 }
  0xbd   : > { %v278_v35 = vmul.f32 %v277_v33, %v1044_v2  ;;  %v521_v33 = vld [vmem:[%s1258_s4 + $0x30] sm:$0xff] }
  0xbf   : > { %279 = vst.msk [vmem:[#allocation2 + $0x4] sm:$0xff] %vm271_vm0, %v278_v35  ;;  %v833_v35 = vpack.c.bf16 %v522_v34, %v521_v33 }
  0xc6   : > { %v305_v50 = vld [vmem:[#allocation2 + $0x5] sm:$0xff] }
  0xc7   : > { %v282_v51 = vld [vmem:[#allocation2 + $0x1] sm:$0xff]  ;;  %307 = vrot.lane.b32.xlu0 %v305_v50, %s949_s9 }
  0xc8   : > { %284 = vrot.lane.b32.xlu1 %v282_v51, %s949_s9  ;;  %v323_v53 = vld [vmem:[#allocation2 + $0x8] sm:$0xff]  ;;  %v280_v56 = vld [vmem:[#allocation2] sm:$0xff]  ;;  %s703_s9 = sshll.u32 %s1009_s25, 7  ;;  %s882_s25 = scalar_lea.vmem %s1213_s11, 128 }
  0xc9   : > { %v311_v54 = vld [vmem:[#allocation2 + $0x6] sm:$0xff]  ;;  %324 = vst.msk [vmem:[#allocation3 + $0x10] sm:$0xff] %vm271_vm0, %v323_v53  ;;  %281 = vst.msk [vmem:[#allocation3] sm:$0xff] %vm271_vm0, %v280_v56  ;;  %s1211_s14 = scalar_lea.hbm %s1260_s6, %s703_s9  ;;  %p883_p11 = scmp.ne.s32.totalorder %s1213_s11, %s882_s25 }
  0xca   : > { %v303_v55 = vld [vmem:[#allocation2 + $0x4] sm:$0xff] }
  0xcb   : > { %304 = vst.msk [vmem:[#allocation3 + $0x8] sm:$0xff] %vm271_vm0, %v303_v55  ;;  %v289_v8 = vld [vmem:[#allocation2 + $0x2] sm:$0xff]  ;;  %p884_p12 = pnand %p883_p11, %p1026_p5 }
  0xcc   : > { %313 = vrot.lane.b32.xlu1 %v311_v54, %s950_s28  ;;  %v317_v13 = vld [vmem:[#allocation2 + $0x7] sm:$0xff] }
  0xcd   : > { %v296_v14 = vld [vmem:[#allocation2 + $0x3] sm:$0xff]  ;;  %p885_p13 = pneg %p884_p12 }
  0xd0   : > { %v327_v11 = vld [vmem:[#allocation3 + $0x10] sm:$0xff]  ;;  %291 = vrot.lane.b32.xlu1 %v289_v8, %s950_s28 }
  0xd1   : > { %764 = vmatmul.mubr.msk.f32.vlgmr.msra.gmra.mrb[0].mxu1 %vm271_vm0, %v327_v11 }
  0xd2   : > { %782 = vmatprep.mubr.msk.f32.mxu1 %vm948_vm2, %v946_v5  ;;  %v518_v5 = vld [vmem:[%s1258_s4 + $0x18] sm:$0xff]  ;;  %825 = vmatpush3.bf16.msra.mxu1 %v824_v18 }
  0xd3   : > { %v827_v19 = vpack.c.bf16 %v518_v5, %v517_v17  ;;  %826 = vmatprep.subr.bf16.mxu1 %v947_v6 }
  0xd4   : > { %319 = vrot.lane.b32.xlu1 %v317_v13, %s951_s16 }
  0xd6   : > { %828 = vmatpush3.bf16.msra.mxu1 %v827_v19 }
  0xd7   : > { %829 = vmatprep.subr.bf16.mxu1 %v947_v6 }
  0xd8   : > { %298 = vrot.lane.b32.xlu1 %v296_v14, %s951_s16  ;;  %s952_s16 = smov [#allocation4]  }
  0xd9   : > { %s886_s17 = sshll.u32 %s952_s16, 4  ;;  %s887_s17 = int_to_ptr.vmem [resolvable:$false] %s886_s17 }
  0xda   : > { %831 = vmatpush3.bf16.msra.mxu1 %v830_v32  ;;  %s888_s18 = scalar_lea.vmem %s887_s17, 256  ;;  %p889_p0 = scmp.lt.s32.totalorder %s1213_s11, %s887_s17 }
  0xdb   : > { %832 = vmatprep.subr.bf16.mxu1 %v947_v6  ;;  %p890_p1 = scmp.lt.s32.totalorder %s888_s18, %s882_s25 }
  0xdd   : > { %p891_p2 = por %p890_p1, %p889_p0 }
  0xde   : > { %834 = vmatpush3.bf16.msra.mxu1 %v833_v35 }
  0xdf   : > { %p892_p3 = pnand %p891_p2, %p885_p13 }
 0x139   : > { %v308_v20 = vpop.permute.xlu0 %307 }
 0x13a   : > { %v285_v21 = vpop.permute.xlu1 %284  ;;  %310 = vst.msk [vmem:[#allocation3 + $0x8] sm:$0xff] %vm287_vm3, %v308_v20 }
 0x13b   : > { %288 = vst.msk [vmem:[#allocation3] sm:$0xff] %vm287_vm3, %v285_v21 }
 0x13e   : > { %v314_v22 = vpop.permute.xlu1 %313 }
 0x13f   : > { %316 = vst.msk [vmem:[#allocation3 + $0x8] sm:$0xff] %vm294_vm4, %v314_v22 }
 0x142   : > { %v292_v23 = vpop.permute.xlu1 %291 }
 0x143   : > { %295 = vst.msk [vmem:[#allocation3] sm:$0xff] %vm294_vm4, %v292_v23 }
 0x146   : > { %v320_v24 = vpop.permute.xlu1 %319 }
 0x147   : > { %322 = vst.msk [vmem:[#allocation3 + $0x8] sm:$0xff] %vm301_vm5, %v320_v24 }
 0x14a   : > { %v299_v25 = vpop.permute.xlu1 %298 }
 0x14b   : > { %302 = vst.msk [vmem:[#allocation3] sm:$0xff] %vm301_vm5, %v299_v25 }
 0x14e   : > { %v326_v26 = vld [vmem:[#allocation3 + $0x8] sm:$0xff] }
 0x14f   : > { %438 = vmatprep.mubr.f32.mxu0 %v326_v26 }
 0x152   : > { %v325_v27 = vld [vmem:[#allocation3] sm:$0xff] }
 0x153   : > { %439 = vmatmul.mubr.f32.vlgmr.msra.gmra.mrb[0].mxu0 %v325_v27 }
 0x1a4   : > { %v510_v28 = vpop.f32.mrb[0].mxu1 }
 0x1a5   : > { %v765_v29 = vpop.f32.mrb[1].mxu1 }
 0x226   : > { %v738_v36 = vpop.f32.mrb[0].mxu0 }
 0x227   : > { %v739_v38 = vpop.f32.mrb[1].mxu0 }
 0x228   : > { %v740_v39 = vadd.f32 %v739_v38, %v738_v36 }
 0x22a   : > { %v441_v40 = vadd.f32 %v740_v39, %v698_v37 }
 0x22c   : > { %v511_v6 = vadd.f32 %v510_v28, %v441_v40 }
 0x22e   : > { %v514_v41 = vmax.f32 %v511_v6, 0.0 }
 0x230   : > { %783 = vmatmul.mubr.msk.f32.vlgmr.msra.gmra.mrb[2].mxu1 %vm530_vm6, %v514_v41 }
 0x303   : > { %v600_v43 = vpop.f32.mrb[2].mxu1 }
 0x304   : > { %v601_v44 = vadd.f32 %v700_v42, %v600_v43  ;;  %v784_v45 = vpop.f32.mrb[3].mxu1 }
 0x306   : > { %v604_v46 = vadd.f32 %v601_v44, %v1044_v2 }
 0x308   : > { %605 = vst.msk [vmem:[%s255_s10] sm:$0xff] %vm271_vm0, %v604_v46 }
 0x309   : > { %895 = shalt.err (!%p892_p3)
}
 0x30a   : > { %s896_s19 = scalar_lea.hbm %s1211_s14, 128  ;;  %s900_s28 = scalar_lea.hbm %s1260_s6, 256 }
 0x30b   : > { %p897_p4 = scmp.ne.s32.totalorder %s1211_s14, %s896_s19  ;;  %p901_p9 = scmp.lt.u32.totalorder %s1211_s14, %s1260_s6 }
 0x30c   : > { %p902_p10 = scmp.lt.u32.totalorder %s900_s28, %s896_s19  ;;  %p904_p12 = scmp.lt.u32.totalorder %s896_s19, %s1211_s14 }
 0x30d   : > { %p898_p7 = pnand %p897_p4, %p1026_p5 }
 0x30e   : > { %p903_p11 = por %p902_p10, %p901_p9 }
 0x30f   : > { %p899_p8 = pneg %p898_p7 }
 0x310   : > { %p905_p13 = por %p904_p12, %p903_p11 }
 0x312   : > { %p906_p0 = pnand %p905_p13, %p899_p8 }
 0x314   : > { %909 = shalt.err (!%p906_p0)
}
 0x315   : > { %835 = dma.vmem_to_hbm [thread:$0]  (%p1026_p5), %s1213_s11, 128, %s1211_s14, %s607_s15  }
 0x316 PF: > { %p841_p1 = scmp.ge.s32.totalorder %s944_s24, 2  ;;  %s632_s10 = sand.u32 1, %s932_s21  }
 0x317   : > { %s633_s12 = scalar_lea.sflag [#allocation5], %s632_s10 }
 0x318   : > { %p838_p2 = pnand %p841_p1, %p1030_p6 }
 0x31a   : > { %927 = dma.done.wait (!%p838_p2), %s633_s12, 128  }
 0x31b   : > { %929 = vsyncadd (!%p838_p2), %s633_s12, 4294967168  ;;  %p16_p3 = scmp.ge.s32.totalorder %s1013_s27, 4   ;;  %s1263_s21 = smov %s936_s22 }
 0x31c   : > { %s1264_s22 = smov %s940_s23  ;;  %s1265_s23 = smov %s1024_s30 }
 0x31d   : > { %s1266_s24 = smov %s1013_s27  ;;  %18 = sbr.rel (!%p16_p3) target bundleno = 3 (0x3), region = 82 }
 0x324   :  { %638 = vsyncpa [#allocation5], 1 }
 0x325   :  { %640 = vsyncpa [#allocation5 + $0x1], 1 }

</bundles_post_ra>
